<compile_context>
chip_gen: v5e
topology: v5e:2x2
jax: 0.10.0
libtpu: 0.0.40
codegen_flags: <defaults>
</compile_context>

<pallas_src>
import math

import jax
import jax.numpy as jnp
from jax.experimental import pallas as pl
from jax.experimental.pallas import tpu as pltpu  # noqa: F401

# ----------------------------- configuration --------------------------------
VOCAB = 64   # vocab_size
B     = 2    # batch_size   (shape[0])
S     = 8    # max_len      (shape[1])
D     = 32   # dmodel       (shape[2])
H     = 4    # heads
DH    = D // H
DFF   = 4 * D
EPS   = 1e-5


# ------------------------------ Pallas kernel --------------------------------
def pretraining_kernel(
    x_ref,                                   # (B*S, D)   embedded + pos-enc
    wqkv_ref, bqkv_ref,                      # (D, 3D), (1, 3D)  (scale folded into Q)
    wo_ref, bo_ref,                          # (D, D), (1, D)
    g1_ref, be1_ref,                         # (1, D), (1, D)   layernorm 1
    w1_ref, bf1_ref,                         # (D, DFF), (1, DFF)
    w2_ref, bf2_ref,                         # (DFF, D), (1, D)
    g2_ref, be2_ref,                         # (1, D), (1, D)   layernorm 2
    wout_ref, bout_ref,                      # (S*D, VOCAB), (1, VOCAB)
    out_ref,                                 # (B, VOCAB)
):
    x = x_ref[...]                           # (B*S, D) slab

    # ---------------- fused Q/K/V projection (one GEMM for the whole batch) --
    qkv = jnp.dot(x, wqkv_ref[...], preferred_element_type=jnp.float32) \
        + bqkv_ref[...]                      # (B*S, 3D)

    # ---------------- multi-head self-attention (softmax per batch element) --
    head_rows = []
    for b in range(B):                       # static, B small
        qkv_b = qkv[b * S:(b + 1) * S, :]    # (S, 3D)
        ohs = []
        for h in range(H):                   # static, H small
            q = qkv_b[:, h * DH:(h + 1) * DH]
            k = qkv_b[:, D + h * DH:D + (h + 1) * DH]
            v = qkv_b[:, 2 * D + h * DH:2 * D + (h + 1) * DH]
            sc = jnp.dot(q, k.T, preferred_element_type=jnp.float32)   # scale folded in Wq
            sc = sc - jnp.max(sc, axis=-1, keepdims=True)
            p = jnp.exp(sc)
            p = p * pl.reciprocal(jnp.sum(p, axis=-1, keepdims=True), approx=True)
            ohs.append(jnp.dot(p, v, preferred_element_type=jnp.float32))  # (S, DH)
        head_rows.append(jnp.concatenate(ohs, axis=-1))                    # (S, D)
    heads = jnp.concatenate(head_rows, axis=0)                             # (B*S, D)

    # single output projection: concat(heads) @ Wo + bo
    attn = jnp.dot(heads, wo_ref[...], preferred_element_type=jnp.float32) + bo_ref[...]

    # ---------------- residual + layernorm 1 (full slab) ---------------------
    h1 = x + attn
    mu1 = jnp.mean(h1, axis=-1, keepdims=True)
    var1 = jnp.mean((h1 - mu1) * (h1 - mu1), axis=-1, keepdims=True)
    h1n = (h1 - mu1) * jax.lax.rsqrt(var1 + EPS) * g1_ref[...] + be1_ref[...]

    # ---------------- feed-forward (full slab) --------------------------------
    f = jnp.dot(h1n, w1_ref[...], preferred_element_type=jnp.float32) + bf1_ref[...]
    f = jnp.maximum(f, 0.0)
    f = jnp.dot(f, w2_ref[...], preferred_element_type=jnp.float32) + bf2_ref[...]

    # ---------------- residual + layernorm 2 (full slab) ---------------------
    h2 = h1n + f
    mu2 = jnp.mean(h2, axis=-1, keepdims=True)
    var2 = jnp.mean((h2 - mu2) * (h2 - mu2), axis=-1, keepdims=True)
    h2n = (h2 - mu2) * jax.lax.rsqrt(var2 + EPS) * g2_ref[...] + be2_ref[...]

    # ---------------- flatten (s*D + d, row-major) + final Linear -------------
    # Build the (B, S*D) flattened activations with plain row slices + lane
    # concats (no layout-changing reshape), then do ONE (B, S*D)@(S*D, VOCAB)
    # GEMM instead of a loop of 1-row matmuls.
    flat_cols = []
    for si in range(S):
        rows_si = jnp.concatenate(
            [h2n[b * S + si:b * S + si + 1, :] for b in range(B)], axis=0)  # (B, D)
        flat_cols.append(rows_si)
    flat = jnp.concatenate(flat_cols, axis=-1)                              # (B, S*D)

    out_ref[...] = (
        jnp.dot(flat, wout_ref[...], preferred_element_type=jnp.float32)
        + bout_ref[...]
    )


# ------------------------------ wrapper ---------------------------------------
def pretraining_forward(x_emb, fused):
    """x_emb: (B, S, D) float32 embedded+pos-encoded input."""
    (wqkv, bqkv, wo2d, bo, g1, be1, w1, bf1,
     w2, bf2, g2, be2, wout, bout) = fused

    x_flat = x_emb.reshape(B * S, D)   # host-side flatten: rows are b*S + s

    # Single invocation, no grid: every operand lives whole in VMEM
    # (total footprint well under 1 MiB).
    return pl.pallas_call(
        pretraining_kernel,
        out_shape=jax.ShapeDtypeStruct((B, VOCAB), jnp.float32),
    )(x_flat, wqkv, bqkv, wo2d, bo, g1, be1, w1, bf1,
      w2, bf2, g2, be2, wout, bout)


# --------------------- host-side weight fusion (one-time) ---------------------
def fuse_params(params):
    (wq, bq, wk, bk, wv, bv, wo, bo,
     g1, be1, w1, bf1, w2, bf2, g2, be2, wout, bout) = params
    scale = 1.0 / math.sqrt(DH)

    # (H, D, DH) -> (D, H*DH), head-major columns; fold softmax scale into Q
    wq2 = jnp.transpose(wq, (1, 0, 2)).reshape(D, H * DH) * scale
    wk2 = jnp.transpose(wk, (1, 0, 2)).reshape(D, H * DH)
    wv2 = jnp.transpose(wv, (1, 0, 2)).reshape(D, H * DH)
    wqkv = jnp.concatenate([wq2, wk2, wv2], axis=1)          # (D, 3D)

    bq2 = bq.reshape(1, H * DH) * scale
    bk2 = bk.reshape(1, H * DH)
    bv2 = bv.reshape(1, H * DH)
    bqkv = jnp.concatenate([bq2, bk2, bv2], axis=1)          # (1, 3D)

    wo2d = wo.reshape(H * DH, D)                             # (D, D), head-major rows

    return (wqkv, bqkv, wo2d, bo, g1, be1, w1, bf1,
            w2, bf2, g2, be2, wout, bout)


# ------------------------------ pure-JAX reference ----------------------------
def reference_forward(x_emb, params):
    (wq, bq, wk, bk, wv, bv, wo, bo,
     g1, be1, w1, bf1, w2, bf2, g2, be2, wout, bout) = params
    scale = 1.0 / math.sqrt(DH)

    def one(x):
        proj = jnp.zeros((S, D), jnp.float32)
        for h in range(H):
            qh = x @ wq[h] + bq[h]
            kh = x @ wk[h] + bk[h]
            vh = x @ wv[h] + bv[h]
            sc = (qh @ kh.T) * scale
            p = jax.nn.softmax(sc, axis=-1)
            proj = proj + (p @ vh) @ wo[h]
        attn = proj + bo
        h1 = x + attn
        mu = h1.mean(-1, keepdims=True)
        va = ((h1 - mu) ** 2).mean(-1, keepdims=True)
        h1n = (h1 - mu) / jnp.sqrt(va + EPS) * g1 + be1
        f = jnp.maximum(h1n @ w1 + bf1, 0.0) @ w2 + bf2
        h2 = h1n + f
        mu2 = h2.mean(-1, keepdims=True)
        va2 = ((h2 - mu2) ** 2).mean(-1, keepdims=True)
        h2n = (h2 - mu2) / jnp.sqrt(va2 + EPS) * g2 + be2
        return h2n.reshape(-1) @ wout + bout[0]

    return jax.vmap(one)(x_emb)


# ------------------------------ param init & glue -----------------------------
def make_params(key):
    ks = jax.random.split(key, 12)
    sd = 0.02
    wq = jax.random.normal(ks[0], (H, D, DH), jnp.float32) * sd
    wk = jax.random.normal(ks[1], (H, D, DH), jnp.float32) * sd
    wv = jax.random.normal(ks[2], (H, D, DH), jnp.float32) * sd
    wo = jax.random.normal(ks[3], (H, DH, D), jnp.float32) * sd
    bq = jnp.zeros((H, 1, DH), jnp.float32)
    bk = jnp.zeros((H, 1, DH), jnp.float32)
    bv = jnp.zeros((H, 1, DH), jnp.float32)
    bo = jnp.zeros((1, D), jnp.float32)
    g1 = jnp.ones((1, D), jnp.float32)
    be1 = jnp.zeros((1, D), jnp.float32)
    w1 = jax.random.normal(ks[4], (D, DFF), jnp.float32) * sd
    bf1 = jnp.zeros((1, DFF), jnp.float32)
    w2 = jax.random.normal(ks[5], (DFF, D), jnp.float32) * sd
    bf2 = jnp.zeros((1, D), jnp.float32)
    g2 = jnp.ones((1, D), jnp.float32)
    be2 = jnp.zeros((1, D), jnp.float32)
    wout = jax.random.normal(ks[6], (S * D, VOCAB), jnp.float32) * sd
    bout = jnp.zeros((1, VOCAB), jnp.float32)
    emb = jax.random.normal(ks[7], (VOCAB, D), jnp.float32) * sd
    return (wq, bq, wk, bk, wv, bv, wo, bo,
            g1, be1, w1, bf1, w2, bf2, g2, be2, wout, bout), emb


def positional_encoding(seq_len, dmodel):
    pos = jnp.arange(seq_len)[:, None].astype(jnp.float32)
    i = jnp.arange(dmodel // 2)[None, :].astype(jnp.float32)
    angle = pos / jnp.power(10000.0, 2.0 * i / dmodel)
    pe = jnp.zeros((seq_len, dmodel), jnp.float32)
    pe = pe.at[:, 0::2].set(jnp.sin(angle))
    pe = pe.at[:, 1::2].set(jnp.cos(angle))
    return pe


if __name__ == "__main__":
    key = jax.random.PRNGKey(0)
    pkey, tkey = jax.random.split(key)
    params, emb_table = make_params(pkey)
    fused = fuse_params(params)

    # token ids -> embedding + sinusoidal positional encoding (JAX glue)
    tokens = jax.random.randint(tkey, (B, S), 0, VOCAB)          # (2, 8)
    x_emb = emb_table[tokens] * math.sqrt(D) + positional_encoding(S, D)[None]
    x_emb = x_emb.astype(jnp.float32)                            # (B, S, D)

    out = pretraining_forward(x_emb, fused)                      # (B, VOCAB)
    out = jax.block_until_ready(out)

    ref = reference_forward(x_emb, params)
    assert out.shape == (B, VOCAB)
    # slightly relaxed tolerance: softmax denominator uses the approximate
    # EUP reciprocal inside the kernel
    assert jnp.allclose(out, ref, rtol=2e-3, atol=2e-3), "mismatch vs reference"

    print("KERNEL_OK")
</pallas_src>

<mosaic_0001>
module attributes {stable_mosaic.version = 11 : i64} {
  func.func @pretraining_kernel(%arg0: memref<16x32xf32, #tpu.memory_space<vmem>>, %arg1: memref<32x96xf32, #tpu.memory_space<vmem>>, %arg2: memref<1x96xf32, #tpu.memory_space<vmem>>, %arg3: memref<32x32xf32, #tpu.memory_space<vmem>>, %arg4: memref<1x32xf32, #tpu.memory_space<vmem>>, %arg5: memref<1x32xf32, #tpu.memory_space<vmem>>, %arg6: memref<1x32xf32, #tpu.memory_space<vmem>>, %arg7: memref<32x128xf32, #tpu.memory_space<vmem>>, %arg8: memref<1x128xf32, #tpu.memory_space<vmem>>, %arg9: memref<128x32xf32, #tpu.memory_space<vmem>>, %arg10: memref<1x32xf32, #tpu.memory_space<vmem>>, %arg11: memref<1x32xf32, #tpu.memory_space<vmem>>, %arg12: memref<1x32xf32, #tpu.memory_space<vmem>>, %arg13: memref<256x64xf32, #tpu.memory_space<vmem>>, %arg14: memref<1x64xf32, #tpu.memory_space<vmem>>, %arg15: memref<2x64xf32, #tpu.memory_space<vmem>>) attributes {dimension_semantics = [], scalar_prefetch = 0 : i64, scratch_operands = 0 : i64, tpu.core_type = #tpu.core_type<tc>} {
    %c0 = arith.constant 0 : index
    %c0_0 = arith.constant 0 : index
    %0 = vector.load %arg0[%c0, %c0_0] : memref<16x32xf32, #tpu.memory_space<vmem>>, vector<16x32xf32>
    %c0_1 = arith.constant 0 : index
    %c0_2 = arith.constant 0 : index
    %1 = vector.load %arg1[%c0_1, %c0_2] : memref<32x96xf32, #tpu.memory_space<vmem>>, vector<32x96xf32>
    %cst = arith.constant dense<0.000000e+00> : vector<16x96xf32>
    %2 = tpu.matmul %0, %1, %cst {dimension_numbers = #tpu.dot_dimension_numbers<[1], [0], [0], [1], [0, 0, 1, 1], [], []>} : vector<16x32xf32>, vector<32x96xf32>, vector<16x96xf32> -> vector<16x96xf32>
    %c0_3 = arith.constant 0 : index
    %c0_4 = arith.constant 0 : index
    %3 = vector.load %arg2[%c0_3, %c0_4] : memref<1x96xf32, #tpu.memory_space<vmem>>, vector<1x96xf32>
    %4 = vector.broadcast %3 : vector<1x96xf32> to vector<16x96xf32>
    %5 = arith.addf %2, %4 : vector<16x96xf32>
    %6 = vector.extract_strided_slice %5 {offsets = [0, 0], sizes = [8, 96], strides = [1, 1]} : vector<16x96xf32> to vector<8x96xf32>
    %7 = vector.extract_strided_slice %6 {offsets = [0, 0], sizes = [8, 8], strides = [1, 1]} : vector<8x96xf32> to vector<8x8xf32>
    %8 = vector.extract_strided_slice %6 {offsets = [0, 32], sizes = [8, 8], strides = [1, 1]} : vector<8x96xf32> to vector<8x8xf32>
    %9 = vector.extract_strided_slice %6 {offsets = [0, 64], sizes = [8, 8], strides = [1, 1]} : vector<8x96xf32> to vector<8x8xf32>
    %10 = tpu.transpose %8, [1, 0] : vector<8x8xf32> -> vector<8x8xf32>
    %cst_5 = arith.constant dense<0.000000e+00> : vector<8x8xf32>
    %11 = tpu.matmul %7, %10, %cst_5 {dimension_numbers = #tpu.dot_dimension_numbers<[1], [0], [0], [1], [0, 0, 1, 1], [], []>} : vector<8x8xf32>, vector<8x8xf32>, vector<8x8xf32> -> vector<8x8xf32>
    %cst_6 = arith.constant dense<0xFF800000> : vector<8xf32>
    %12 = vector.multi_reduction <maximumf>, %11, %cst_6 [1] : vector<8x8xf32> to vector<8xf32>
    %13 = vector.shape_cast %12 : vector<8xf32> to vector<8x1xf32>
    %14 = vector.broadcast %13 : vector<8x1xf32> to vector<8x8xf32>
    %15 = arith.subf %11, %14 : vector<8x8xf32>
    %16 = math.exp %15 : vector<8x8xf32>
    %cst_7 = arith.constant dense<0.000000e+00> : vector<8xf32>
    %17 = vector.multi_reduction <add>, %16, %cst_7 [1] : vector<8x8xf32> to vector<8xf32>
    %18 = vector.shape_cast %17 : vector<8xf32> to vector<8x1xf32>
    %19 = tpu.reciprocal %18 {approx = true} : vector<8x1xf32> -> vector<8x1xf32>
    %20 = vector.broadcast %19 : vector<8x1xf32> to vector<8x8xf32>
    %21 = arith.mulf %16, %20 : vector<8x8xf32>
    %cst_8 = arith.constant dense<0.000000e+00> : vector<8x8xf32>
    %22 = tpu.matmul %21, %9, %cst_8 {dimension_numbers = #tpu.dot_dimension_numbers<[1], [0], [0], [1], [0, 0, 1, 1], [], []>} : vector<8x8xf32>, vector<8x8xf32>, vector<8x8xf32> -> vector<8x8xf32>
    %23 = vector.extract_strided_slice %6 {offsets = [0, 8], sizes = [8, 8], strides = [1, 1]} : vector<8x96xf32> to vector<8x8xf32>
    %24 = vector.extract_strided_slice %6 {offsets = [0, 40], sizes = [8, 8], strides = [1, 1]} : vector<8x96xf32> to vector<8x8xf32>
    %25 = vector.extract_strided_slice %6 {offsets = [0, 72], sizes = [8, 8], strides = [1, 1]} : vector<8x96xf32> to vector<8x8xf32>
    %26 = tpu.transpose %24, [1, 0] : vector<8x8xf32> -> vector<8x8xf32>
    %cst_9 = arith.constant dense<0.000000e+00> : vector<8x8xf32>
    %27 = tpu.matmul %23, %26, %cst_9 {dimension_numbers = #tpu.dot_dimension_numbers<[1], [0], [0], [1], [0, 0, 1, 1], [], []>} : vector<8x8xf32>, vector<8x8xf32>, vector<8x8xf32> -> vector<8x8xf32>
    %cst_10 = arith.constant dense<0xFF800000> : vector<8xf32>
    %28 = vector.multi_reduction <maximumf>, %27, %cst_10 [1] : vector<8x8xf32> to vector<8xf32>
    %29 = vector.shape_cast %28 : vector<8xf32> to vector<8x1xf32>
    %30 = vector.broadcast %29 : vector<8x1xf32> to vector<8x8xf32>
    %31 = arith.subf %27, %30 : vector<8x8xf32>
    %32 = math.exp %31 : vector<8x8xf32>
    %cst_11 = arith.constant dense<0.000000e+00> : vector<8xf32>
    %33 = vector.multi_reduction <add>, %32, %cst_11 [1] : vector<8x8xf32> to vector<8xf32>
    %34 = vector.shape_cast %33 : vector<8xf32> to vector<8x1xf32>
    %35 = tpu.reciprocal %34 {approx = true} : vector<8x1xf32> -> vector<8x1xf32>
    %36 = vector.broadcast %35 : vector<8x1xf32> to vector<8x8xf32>
    %37 = arith.mulf %32, %36 : vector<8x8xf32>
    %cst_12 = arith.constant dense<0.000000e+00> : vector<8x8xf32>
    %38 = tpu.matmul %37, %25, %cst_12 {dimension_numbers = #tpu.dot_dimension_numbers<[1], [0], [0], [1], [0, 0, 1, 1], [], []>} : vector<8x8xf32>, vector<8x8xf32>, vector<8x8xf32> -> vector<8x8xf32>
    %39 = vector.extract_strided_slice %6 {offsets = [0, 16], sizes = [8, 8], strides = [1, 1]} : vector<8x96xf32> to vector<8x8xf32>
    %40 = vector.extract_strided_slice %6 {offsets = [0, 48], sizes = [8, 8], strides = [1, 1]} : vector<8x96xf32> to vector<8x8xf32>
    %41 = vector.extract_strided_slice %6 {offsets = [0, 80], sizes = [8, 8], strides = [1, 1]} : vector<8x96xf32> to vector<8x8xf32>
    %42 = tpu.transpose %40, [1, 0] : vector<8x8xf32> -> vector<8x8xf32>
    %cst_13 = arith.constant dense<0.000000e+00> : vector<8x8xf32>
    %43 = tpu.matmul %39, %42, %cst_13 {dimension_numbers = #tpu.dot_dimension_numbers<[1], [0], [0], [1], [0, 0, 1, 1], [], []>} : vector<8x8xf32>, vector<8x8xf32>, vector<8x8xf32> -> vector<8x8xf32>
    %cst_14 = arith.constant dense<0xFF800000> : vector<8xf32>
    %44 = vector.multi_reduction <maximumf>, %43, %cst_14 [1] : vector<8x8xf32> to vector<8xf32>
    %45 = vector.shape_cast %44 : vector<8xf32> to vector<8x1xf32>
    %46 = vector.broadcast %45 : vector<8x1xf32> to vector<8x8xf32>
    %47 = arith.subf %43, %46 : vector<8x8xf32>
    %48 = math.exp %47 : vector<8x8xf32>
    %cst_15 = arith.constant dense<0.000000e+00> : vector<8xf32>
    %49 = vector.multi_reduction <add>, %48, %cst_15 [1] : vector<8x8xf32> to vector<8xf32>
    %50 = vector.shape_cast %49 : vector<8xf32> to vector<8x1xf32>
    %51 = tpu.reciprocal %50 {approx = true} : vector<8x1xf32> -> vector<8x1xf32>
    %52 = vector.broadcast %51 : vector<8x1xf32> to vector<8x8xf32>
    %53 = arith.mulf %48, %52 : vector<8x8xf32>
    %cst_16 = arith.constant dense<0.000000e+00> : vector<8x8xf32>
    %54 = tpu.matmul %53, %41, %cst_16 {dimension_numbers = #tpu.dot_dimension_numbers<[1], [0], [0], [1], [0, 0, 1, 1], [], []>} : vector<8x8xf32>, vector<8x8xf32>, vector<8x8xf32> -> vector<8x8xf32>
    %55 = vector.extract_strided_slice %6 {offsets = [0, 24], sizes = [8, 8], strides = [1, 1]} : vector<8x96xf32> to vector<8x8xf32>
    %56 = vector.extract_strided_slice %6 {offsets = [0, 56], sizes = [8, 8], strides = [1, 1]} : vector<8x96xf32> to vector<8x8xf32>
    %57 = vector.extract_strided_slice %6 {offsets = [0, 88], sizes = [8, 8], strides = [1, 1]} : vector<8x96xf32> to vector<8x8xf32>
    %58 = tpu.transpose %56, [1, 0] : vector<8x8xf32> -> vector<8x8xf32>
    %cst_17 = arith.constant dense<0.000000e+00> : vector<8x8xf32>
    %59 = tpu.matmul %55, %58, %cst_17 {dimension_numbers = #tpu.dot_dimension_numbers<[1], [0], [0], [1], [0, 0, 1, 1], [], []>} : vector<8x8xf32>, vector<8x8xf32>, vector<8x8xf32> -> vector<8x8xf32>
    %cst_18 = arith.constant dense<0xFF800000> : vector<8xf32>
    %60 = vector.multi_reduction <maximumf>, %59, %cst_18 [1] : vector<8x8xf32> to vector<8xf32>
    %61 = vector.shape_cast %60 : vector<8xf32> to vector<8x1xf32>
    %62 = vector.broadcast %61 : vector<8x1xf32> to vector<8x8xf32>
    %63 = arith.subf %59, %62 : vector<8x8xf32>
    %64 = math.exp %63 : vector<8x8xf32>
    %cst_19 = arith.constant dense<0.000000e+00> : vector<8xf32>
    %65 = vector.multi_reduction <add>, %64, %cst_19 [1] : vector<8x8xf32> to vector<8xf32>
    %66 = vector.shape_cast %65 : vector<8xf32> to vector<8x1xf32>
    %67 = tpu.reciprocal %66 {approx = true} : vector<8x1xf32> -> vector<8x1xf32>
    %68 = vector.broadcast %67 : vector<8x1xf32> to vector<8x8xf32>
    %69 = arith.mulf %64, %68 : vector<8x8xf32>
    %cst_20 = arith.constant dense<0.000000e+00> : vector<8x8xf32>
    %70 = tpu.matmul %69, %57, %cst_20 {dimension_numbers = #tpu.dot_dimension_numbers<[1], [0], [0], [1], [0, 0, 1, 1], [], []>} : vector<8x8xf32>, vector<8x8xf32>, vector<8x8xf32> -> vector<8x8xf32>
    %71 = tpu.concatenate %22, %38, %54, %70 in 1 : vector<8x8xf32>, vector<8x8xf32>, vector<8x8xf32>, vector<8x8xf32> -> vector<8x32xf32>
    %72 = vector.extract_strided_slice %5 {offsets = [8, 0], sizes = [8, 96], strides = [1, 1]} : vector<16x96xf32> to vector<8x96xf32>
    %73 = vector.extract_strided_slice %72 {offsets = [0, 0], sizes = [8, 8], strides = [1, 1]} : vector<8x96xf32> to vector<8x8xf32>
    %74 = vector.extract_strided_slice %72 {offsets = [0, 32], sizes = [8, 8], strides = [1, 1]} : vector<8x96xf32> to vector<8x8xf32>
    %75 = vector.extract_strided_slice %72 {offsets = [0, 64], sizes = [8, 8], strides = [1, 1]} : vector<8x96xf32> to vector<8x8xf32>
    %76 = tpu.transpose %74, [1, 0] : vector<8x8xf32> -> vector<8x8xf32>
    %cst_21 = arith.constant dense<0.000000e+00> : vector<8x8xf32>
    %77 = tpu.matmul %73, %76, %cst_21 {dimension_numbers = #tpu.dot_dimension_numbers<[1], [0], [0], [1], [0, 0, 1, 1], [], []>} : vector<8x8xf32>, vector<8x8xf32>, vector<8x8xf32> -> vector<8x8xf32>
    %cst_22 = arith.constant dense<0xFF800000> : vector<8xf32>
    %78 = vector.multi_reduction <maximumf>, %77, %cst_22 [1] : vector<8x8xf32> to vector<8xf32>
    %79 = vector.shape_cast %78 : vector<8xf32> to vector<8x1xf32>
    %80 = vector.broadcast %79 : vector<8x1xf32> to vector<8x8xf32>
    %81 = arith.subf %77, %80 : vector<8x8xf32>
    %82 = math.exp %81 : vector<8x8xf32>
    %cst_23 = arith.constant dense<0.000000e+00> : vector<8xf32>
    %83 = vector.multi_reduction <add>, %82, %cst_23 [1] : vector<8x8xf32> to vector<8xf32>
    %84 = vector.shape_cast %83 : vector<8xf32> to vector<8x1xf32>
    %85 = tpu.reciprocal %84 {approx = true} : vector<8x1xf32> -> vector<8x1xf32>
    %86 = vector.broadcast %85 : vector<8x1xf32> to vector<8x8xf32>
    %87 = arith.mulf %82, %86 : vector<8x8xf32>
    %cst_24 = arith.constant dense<0.000000e+00> : vector<8x8xf32>
    %88 = tpu.matmul %87, %75, %cst_24 {dimension_numbers = #tpu.dot_dimension_numbers<[1], [0], [0], [1], [0, 0, 1, 1], [], []>} : vector<8x8xf32>, vector<8x8xf32>, vector<8x8xf32> -> vector<8x8xf32>
    %89 = vector.extract_strided_slice %72 {offsets = [0, 8], sizes = [8, 8], strides = [1, 1]} : vector<8x96xf32> to vector<8x8xf32>
    %90 = vector.extract_strided_slice %72 {offsets = [0, 40], sizes = [8, 8], strides = [1, 1]} : vector<8x96xf32> to vector<8x8xf32>
    %91 = vector.extract_strided_slice %72 {offsets = [0, 72], sizes = [8, 8], strides = [1, 1]} : vector<8x96xf32> to vector<8x8xf32>
    %92 = tpu.transpose %90, [1, 0] : vector<8x8xf32> -> vector<8x8xf32>
    %cst_25 = arith.constant dense<0.000000e+00> : vector<8x8xf32>
    %93 = tpu.matmul %89, %92, %cst_25 {dimension_numbers = #tpu.dot_dimension_numbers<[1], [0], [0], [1], [0, 0, 1, 1], [], []>} : vector<8x8xf32>, vector<8x8xf32>, vector<8x8xf32> -> vector<8x8xf32>
    %cst_26 = arith.constant dense<0xFF800000> : vector<8xf32>
    %94 = vector.multi_reduction <maximumf>, %93, %cst_26 [1] : vector<8x8xf32> to vector<8xf32>
    %95 = vector.shape_cast %94 : vector<8xf32> to vector<8x1xf32>
    %96 = vector.broadcast %95 : vector<8x1xf32> to vector<8x8xf32>
    %97 = arith.subf %93, %96 : vector<8x8xf32>
    %98 = math.exp %97 : vector<8x8xf32>
    %cst_27 = arith.constant dense<0.000000e+00> : vector<8xf32>
    %99 = vector.multi_reduction <add>, %98, %cst_27 [1] : vector<8x8xf32> to vector<8xf32>
    %100 = vector.shape_cast %99 : vector<8xf32> to vector<8x1xf32>
    %101 = tpu.reciprocal %100 {approx = true} : vector<8x1xf32> -> vector<8x1xf32>
    %102 = vector.broadcast %101 : vector<8x1xf32> to vector<8x8xf32>
    %103 = arith.mulf %98, %102 : vector<8x8xf32>
    %cst_28 = arith.constant dense<0.000000e+00> : vector<8x8xf32>
    %104 = tpu.matmul %103, %91, %cst_28 {dimension_numbers = #tpu.dot_dimension_numbers<[1], [0], [0], [1], [0, 0, 1, 1], [], []>} : vector<8x8xf32>, vector<8x8xf32>, vector<8x8xf32> -> vector<8x8xf32>
    %105 = vector.extract_strided_slice %72 {offsets = [0, 16], sizes = [8, 8], strides = [1, 1]} : vector<8x96xf32> to vector<8x8xf32>
    %106 = vector.extract_strided_slice %72 {offsets = [0, 48], sizes = [8, 8], strides = [1, 1]} : vector<8x96xf32> to vector<8x8xf32>
    %107 = vector.extract_strided_slice %72 {offsets = [0, 80], sizes = [8, 8], strides = [1, 1]} : vector<8x96xf32> to vector<8x8xf32>
    %108 = tpu.transpose %106, [1, 0] : vector<8x8xf32> -> vector<8x8xf32>
    %cst_29 = arith.constant dense<0.000000e+00> : vector<8x8xf32>
    %109 = tpu.matmul %105, %108, %cst_29 {dimension_numbers = #tpu.dot_dimension_numbers<[1], [0], [0], [1], [0, 0, 1, 1], [], []>} : vector<8x8xf32>, vector<8x8xf32>, vector<8x8xf32> -> vector<8x8xf32>
    %cst_30 = arith.constant dense<0xFF800000> : vector<8xf32>
    %110 = vector.multi_reduction <maximumf>, %109, %cst_30 [1] : vector<8x8xf32> to vector<8xf32>
    %111 = vector.shape_cast %110 : vector<8xf32> to vector<8x1xf32>
    %112 = vector.broadcast %111 : vector<8x1xf32> to vector<8x8xf32>
    %113 = arith.subf %109, %112 : vector<8x8xf32>
    %114 = math.exp %113 : vector<8x8xf32>
    %cst_31 = arith.constant dense<0.000000e+00> : vector<8xf32>
    %115 = vector.multi_reduction <add>, %114, %cst_31 [1] : vector<8x8xf32> to vector<8xf32>
    %116 = vector.shape_cast %115 : vector<8xf32> to vector<8x1xf32>
    %117 = tpu.reciprocal %116 {approx = true} : vector<8x1xf32> -> vector<8x1xf32>
    %118 = vector.broadcast %117 : vector<8x1xf32> to vector<8x8xf32>
    %119 = arith.mulf %114, %118 : vector<8x8xf32>
    %cst_32 = arith.constant dense<0.000000e+00> : vector<8x8xf32>
    %120 = tpu.matmul %119, %107, %cst_32 {dimension_numbers = #tpu.dot_dimension_numbers<[1], [0], [0], [1], [0, 0, 1, 1], [], []>} : vector<8x8xf32>, vector<8x8xf32>, vector<8x8xf32> -> vector<8x8xf32>
    %121 = vector.extract_strided_slice %72 {offsets = [0, 24], sizes = [8, 8], strides = [1, 1]} : vector<8x96xf32> to vector<8x8xf32>
    %122 = vector.extract_strided_slice %72 {offsets = [0, 56], sizes = [8, 8], strides = [1, 1]} : vector<8x96xf32> to vector<8x8xf32>
    %123 = vector.extract_strided_slice %72 {offsets = [0, 88], sizes = [8, 8], strides = [1, 1]} : vector<8x96xf32> to vector<8x8xf32>
    %124 = tpu.transpose %122, [1, 0] : vector<8x8xf32> -> vector<8x8xf32>
    %cst_33 = arith.constant dense<0.000000e+00> : vector<8x8xf32>
    %125 = tpu.matmul %121, %124, %cst_33 {dimension_numbers = #tpu.dot_dimension_numbers<[1], [0], [0], [1], [0, 0, 1, 1], [], []>} : vector<8x8xf32>, vector<8x8xf32>, vector<8x8xf32> -> vector<8x8xf32>
    %cst_34 = arith.constant dense<0xFF800000> : vector<8xf32>
    %126 = vector.multi_reduction <maximumf>, %125, %cst_34 [1] : vector<8x8xf32> to vector<8xf32>
    %127 = vector.shape_cast %126 : vector<8xf32> to vector<8x1xf32>
    %128 = vector.broadcast %127 : vector<8x1xf32> to vector<8x8xf32>
    %129 = arith.subf %125, %128 : vector<8x8xf32>
    %130 = math.exp %129 : vector<8x8xf32>
    %cst_35 = arith.constant dense<0.000000e+00> : vector<8xf32>
    %131 = vector.multi_reduction <add>, %130, %cst_35 [1] : vector<8x8xf32> to vector<8xf32>
    %132 = vector.shape_cast %131 : vector<8xf32> to vector<8x1xf32>
    %133 = tpu.reciprocal %132 {approx = true} : vector<8x1xf32> -> vector<8x1xf32>
    %134 = vector.broadcast %133 : vector<8x1xf32> to vector<8x8xf32>
    %135 = arith.mulf %130, %134 : vector<8x8xf32>
    %cst_36 = arith.constant dense<0.000000e+00> : vector<8x8xf32>
    %136 = tpu.matmul %135, %123, %cst_36 {dimension_numbers = #tpu.dot_dimension_numbers<[1], [0], [0], [1], [0, 0, 1, 1], [], []>} : vector<8x8xf32>, vector<8x8xf32>, vector<8x8xf32> -> vector<8x8xf32>
    %137 = tpu.concatenate %88, %104, %120, %136 in 1 : vector<8x8xf32>, vector<8x8xf32>, vector<8x8xf32>, vector<8x8xf32> -> vector<8x32xf32>
    %138 = tpu.concatenate %71, %137 in 0 : vector<8x32xf32>, vector<8x32xf32> -> vector<16x32xf32>
    %c0_37 = arith.constant 0 : index
    %c0_38 = arith.constant 0 : index
    %139 = vector.load %arg3[%c0_37, %c0_38] : memref<32x32xf32, #tpu.memory_space<vmem>>, vector<32x32xf32>
    %cst_39 = arith.constant dense<0.000000e+00> : vector<16x32xf32>
    %140 = tpu.matmul %138, %139, %cst_39 {dimension_numbers = #tpu.dot_dimension_numbers<[1], [0], [0], [1], [0, 0, 1, 1], [], []>} : vector<16x32xf32>, vector<32x32xf32>, vector<16x32xf32> -> vector<16x32xf32>
    %c0_40 = arith.constant 0 : index
    %c0_41 = arith.constant 0 : index
    %141 = vector.load %arg4[%c0_40, %c0_41] : memref<1x32xf32, #tpu.memory_space<vmem>>, vector<1x32xf32>
    %142 = vector.broadcast %141 : vector<1x32xf32> to vector<16x32xf32>
    %143 = arith.addf %140, %142 : vector<16x32xf32>
    %144 = arith.addf %0, %143 : vector<16x32xf32>
    %cst_42 = arith.constant dense<0.000000e+00> : vector<16xf32>
    %145 = vector.multi_reduction <add>, %144, %cst_42 [1] : vector<16x32xf32> to vector<16xf32>
    %146 = vector.shape_cast %145 : vector<16xf32> to vector<16x1xf32>
    %cst_43 = arith.constant 3.200000e+01 : f32
    %147 = vector.broadcast %cst_43 : f32 to vector<16x1xf32>
    %148 = arith.divf %146, %147 : vector<16x1xf32>
    %149 = vector.broadcast %148 : vector<16x1xf32> to vector<16x32xf32>
    %150 = arith.subf %144, %149 : vector<16x32xf32>
    %151 = vector.broadcast %148 : vector<16x1xf32> to vector<16x32xf32>
    %152 = arith.subf %144, %151 : vector<16x32xf32>
    %153 = arith.mulf %150, %152 : vector<16x32xf32>
    %cst_44 = arith.constant dense<0.000000e+00> : vector<16xf32>
    %154 = vector.multi_reduction <add>, %153, %cst_44 [1] : vector<16x32xf32> to vector<16xf32>
    %155 = vector.shape_cast %154 : vector<16xf32> to vector<16x1xf32>
    %cst_45 = arith.constant 3.200000e+01 : f32
    %156 = vector.broadcast %cst_45 : f32 to vector<16x1xf32>
    %157 = arith.divf %155, %156 : vector<16x1xf32>
    %158 = vector.broadcast %148 : vector<16x1xf32> to vector<16x32xf32>
    %159 = arith.subf %144, %158 : vector<16x32xf32>
    %cst_46 = arith.constant 9.99999974E-6 : f32
    %160 = vector.broadcast %cst_46 : f32 to vector<16x1xf32>
    %161 = arith.addf %157, %160 : vector<16x1xf32>
    %162 = math.rsqrt %161 : vector<16x1xf32>
    %163 = vector.broadcast %162 : vector<16x1xf32> to vector<16x32xf32>
    %164 = arith.mulf %159, %163 : vector<16x32xf32>
    %c0_47 = arith.constant 0 : index
    %c0_48 = arith.constant 0 : index
    %165 = vector.load %arg5[%c0_47, %c0_48] : memref<1x32xf32, #tpu.memory_space<vmem>>, vector<1x32xf32>
    %166 = vector.broadcast %165 : vector<1x32xf32> to vector<16x32xf32>
    %167 = arith.mulf %164, %166 : vector<16x32xf32>
    %c0_49 = arith.constant 0 : index
    %c0_50 = arith.constant 0 : index
    %168 = vector.load %arg6[%c0_49, %c0_50] : memref<1x32xf32, #tpu.memory_space<vmem>>, vector<1x32xf32>
    %169 = vector.broadcast %168 : vector<1x32xf32> to vector<16x32xf32>
    %170 = arith.addf %167, %169 : vector<16x32xf32>
    %c0_51 = arith.constant 0 : index
    %c0_52 = arith.constant 0 : index
    %171 = vector.load %arg7[%c0_51, %c0_52] : memref<32x128xf32, #tpu.memory_space<vmem>>, vector<32x128xf32>
    %cst_53 = arith.constant dense<0.000000e+00> : vector<16x128xf32>
    %172 = tpu.matmul %170, %171, %cst_53 {dimension_numbers = #tpu.dot_dimension_numbers<[1], [0], [0], [1], [0, 0, 1, 1], [], []>} : vector<16x32xf32>, vector<32x128xf32>, vector<16x128xf32> -> vector<16x128xf32>
    %c0_54 = arith.constant 0 : index
    %c0_55 = arith.constant 0 : index
    %173 = vector.load %arg8[%c0_54, %c0_55] : memref<1x128xf32, #tpu.memory_space<vmem>>, vector<1x128xf32>
    %174 = vector.broadcast %173 : vector<1x128xf32> to vector<16x128xf32>
    %175 = arith.addf %172, %174 : vector<16x128xf32>
    %cst_56 = arith.constant 0.000000e+00 : f32
    %176 = vector.broadcast %cst_56 : f32 to vector<16x128xf32>
    %177 = arith.maximumf %175, %176 : vector<16x128xf32>
    %c0_57 = arith.constant 0 : index
    %c0_58 = arith.constant 0 : index
    %178 = vector.load %arg9[%c0_57, %c0_58] : memref<128x32xf32, #tpu.memory_space<vmem>>, vector<128x32xf32>
    %cst_59 = arith.constant dense<0.000000e+00> : vector<16x32xf32>
    %179 = tpu.matmul %177, %178, %cst_59 {dimension_numbers = #tpu.dot_dimension_numbers<[1], [0], [0], [1], [0, 0, 1, 1], [], []>} : vector<16x128xf32>, vector<128x32xf32>, vector<16x32xf32> -> vector<16x32xf32>
    %c0_60 = arith.constant 0 : index
    %c0_61 = arith.constant 0 : index
    %180 = vector.load %arg10[%c0_60, %c0_61] : memref<1x32xf32, #tpu.memory_space<vmem>>, vector<1x32xf32>
    %181 = vector.broadcast %180 : vector<1x32xf32> to vector<16x32xf32>
    %182 = arith.addf %179, %181 : vector<16x32xf32>
    %183 = arith.addf %170, %182 : vector<16x32xf32>
    %cst_62 = arith.constant dense<0.000000e+00> : vector<16xf32>
    %184 = vector.multi_reduction <add>, %183, %cst_62 [1] : vector<16x32xf32> to vector<16xf32>
    %185 = vector.shape_cast %184 : vector<16xf32> to vector<16x1xf32>
    %cst_63 = arith.constant 3.200000e+01 : f32
    %186 = vector.broadcast %cst_63 : f32 to vector<16x1xf32>
    %187 = arith.divf %185, %186 : vector<16x1xf32>
    %188 = vector.broadcast %187 : vector<16x1xf32> to vector<16x32xf32>
    %189 = arith.subf %183, %188 : vector<16x32xf32>
    %190 = vector.broadcast %187 : vector<16x1xf32> to vector<16x32xf32>
    %191 = arith.subf %183, %190 : vector<16x32xf32>
    %192 = arith.mulf %189, %191 : vector<16x32xf32>
    %cst_64 = arith.constant dense<0.000000e+00> : vector<16xf32>
    %193 = vector.multi_reduction <add>, %192, %cst_64 [1] : vector<16x32xf32> to vector<16xf32>
    %194 = vector.shape_cast %193 : vector<16xf32> to vector<16x1xf32>
    %cst_65 = arith.constant 3.200000e+01 : f32
    %195 = vector.broadcast %cst_65 : f32 to vector<16x1xf32>
    %196 = arith.divf %194, %195 : vector<16x1xf32>
    %197 = vector.broadcast %187 : vector<16x1xf32> to vector<16x32xf32>
    %198 = arith.subf %183, %197 : vector<16x32xf32>
    %cst_66 = arith.constant 9.99999974E-6 : f32
    %199 = vector.broadcast %cst_66 : f32 to vector<16x1xf32>
    %200 = arith.addf %196, %199 : vector<16x1xf32>
    %201 = math.rsqrt %200 : vector<16x1xf32>
    %202 = vector.broadcast %201 : vector<16x1xf32> to vector<16x32xf32>
    %203 = arith.mulf %198, %202 : vector<16x32xf32>
    %c0_67 = arith.constant 0 : index
    %c0_68 = arith.constant 0 : index
    %204 = vector.load %arg11[%c0_67, %c0_68] : memref<1x32xf32, #tpu.memory_space<vmem>>, vector<1x32xf32>
    %205 = vector.broadcast %204 : vector<1x32xf32> to vector<16x32xf32>
    %206 = arith.mulf %203, %205 : vector<16x32xf32>
    %c0_69 = arith.constant 0 : index
    %c0_70 = arith.constant 0 : index
    %207 = vector.load %arg12[%c0_69, %c0_70] : memref<1x32xf32, #tpu.memory_space<vmem>>, vector<1x32xf32>
    %208 = vector.broadcast %207 : vector<1x32xf32> to vector<16x32xf32>
    %209 = arith.addf %206, %208 : vector<16x32xf32>
    %210 = vector.extract_strided_slice %209 {offsets = [0, 0], sizes = [1, 32], strides = [1, 1]} : vector<16x32xf32> to vector<1x32xf32>
    %211 = vector.extract_strided_slice %209 {offsets = [8, 0], sizes = [1, 32], strides = [1, 1]} : vector<16x32xf32> to vector<1x32xf32>
    %212 = tpu.concatenate %210, %211 in 0 : vector<1x32xf32>, vector<1x32xf32> -> vector<2x32xf32>
    %213 = vector.extract_strided_slice %209 {offsets = [1, 0], sizes = [1, 32], strides = [1, 1]} : vector<16x32xf32> to vector<1x32xf32>
    %214 = vector.extract_strided_slice %209 {offsets = [9, 0], sizes = [1, 32], strides = [1, 1]} : vector<16x32xf32> to vector<1x32xf32>
    %215 = tpu.concatenate %213, %214 in 0 : vector<1x32xf32>, vector<1x32xf32> -> vector<2x32xf32>
    %216 = vector.extract_strided_slice %209 {offsets = [2, 0], sizes = [1, 32], strides = [1, 1]} : vector<16x32xf32> to vector<1x32xf32>
    %217 = vector.extract_strided_slice %209 {offsets = [10, 0], sizes = [1, 32], strides = [1, 1]} : vector<16x32xf32> to vector<1x32xf32>
    %218 = tpu.concatenate %216, %217 in 0 : vector<1x32xf32>, vector<1x32xf32> -> vector<2x32xf32>
    %219 = vector.extract_strided_slice %209 {offsets = [3, 0], sizes = [1, 32], strides = [1, 1]} : vector<16x32xf32> to vector<1x32xf32>
    %220 = vector.extract_strided_slice %209 {offsets = [11, 0], sizes = [1, 32], strides = [1, 1]} : vector<16x32xf32> to vector<1x32xf32>
    %221 = tpu.concatenate %219, %220 in 0 : vector<1x32xf32>, vector<1x32xf32> -> vector<2x32xf32>
    %222 = vector.extract_strided_slice %209 {offsets = [4, 0], sizes = [1, 32], strides = [1, 1]} : vector<16x32xf32> to vector<1x32xf32>
    %223 = vector.extract_strided_slice %209 {offsets = [12, 0], sizes = [1, 32], strides = [1, 1]} : vector<16x32xf32> to vector<1x32xf32>
    %224 = tpu.concatenate %222, %223 in 0 : vector<1x32xf32>, vector<1x32xf32> -> vector<2x32xf32>
    %225 = vector.extract_strided_slice %209 {offsets = [5, 0], sizes = [1, 32], strides = [1, 1]} : vector<16x32xf32> to vector<1x32xf32>
    %226 = vector.extract_strided_slice %209 {offsets = [13, 0], sizes = [1, 32], strides = [1, 1]} : vector<16x32xf32> to vector<1x32xf32>
    %227 = tpu.concatenate %225, %226 in 0 : vector<1x32xf32>, vector<1x32xf32> -> vector<2x32xf32>
    %228 = vector.extract_strided_slice %209 {offsets = [6, 0], sizes = [1, 32], strides = [1, 1]} : vector<16x32xf32> to vector<1x32xf32>
    %229 = vector.extract_strided_slice %209 {offsets = [14, 0], sizes = [1, 32], strides = [1, 1]} : vector<16x32xf32> to vector<1x32xf32>
    %230 = tpu.concatenate %228, %229 in 0 : vector<1x32xf32>, vector<1x32xf32> -> vector<2x32xf32>
    %231 = vector.extract_strided_slice %209 {offsets = [7, 0], sizes = [1, 32], strides = [1, 1]} : vector<16x32xf32> to vector<1x32xf32>
    %232 = vector.extract_strided_slice %209 {offsets = [15, 0], sizes = [1, 32], strides = [1, 1]} : vector<16x32xf32> to vector<1x32xf32>
    %233 = tpu.concatenate %231, %232 in 0 : vector<1x32xf32>, vector<1x32xf32> -> vector<2x32xf32>
    %234 = tpu.concatenate %212, %215, %218, %221, %224, %227, %230, %233 in 1 : vector<2x32xf32>, vector<2x32xf32>, vector<2x32xf32>, vector<2x32xf32>, vector<2x32xf32>, vector<2x32xf32>, vector<2x32xf32>, vector<2x32xf32> -> vector<2x256xf32>
    %c0_71 = arith.constant 0 : index
    %c0_72 = arith.constant 0 : index
    %235 = vector.load %arg13[%c0_71, %c0_72] : memref<256x64xf32, #tpu.memory_space<vmem>>, vector<256x64xf32>
    %cst_73 = arith.constant dense<0.000000e+00> : vector<2x64xf32>
    %236 = tpu.matmul %234, %235, %cst_73 {dimension_numbers = #tpu.dot_dimension_numbers<[1], [0], [0], [1], [0, 0, 1, 1], [], []>} : vector<2x256xf32>, vector<256x64xf32>, vector<2x64xf32> -> vector<2x64xf32>
    %c0_74 = arith.constant 0 : index
    %c0_75 = arith.constant 0 : index
    %237 = vector.load %arg14[%c0_74, %c0_75] : memref<1x64xf32, #tpu.memory_space<vmem>>, vector<1x64xf32>
    %238 = vector.broadcast %237 : vector<1x64xf32> to vector<2x64xf32>
    %239 = arith.addf %236, %238 : vector<2x64xf32>
    %c0_76 = arith.constant 0 : index
    %c0_77 = arith.constant 0 : index
    %240 = vector.load %arg15[%c0_76, %c0_77] : memref<2x64xf32, #tpu.memory_space<vmem>>, vector<2x64xf32>
    tpu.vector_store %arg15[%c0_76, %c0_77], %239 {strides = array<i32>} : memref<2x64xf32, #tpu.memory_space<vmem>>, vector<2x64xf32>,
    return
  }
}

</mosaic_0001>

<bundles_post_ra>
// kernel: tpu_custom_call.1
= control target key start
LH: loop header
LB: loop body
LE: loop exit
PB: predicated region body
PF: predicated region fallthrough
CT: control target
= control target key end

     0   :  { %vm61_vm0 = vcmask 261120   ;;  %s1655_s0 = inlined_call_operand.vmem [shape: f32[16,32], index: 0, kind: input, shape index: {}]   ;;  %s1656_s1 = inlined_call_operand.vmem [shape: f32[32,96], index: 1, kind: input, shape index: {}]   ;;  %s1657_s2 = inlined_call_operand.vmem [shape: f32[1,96], index: 2, kind: input, shape index: {}]   ;;  %s1658_s3 = inlined_call_operand.vmem [shape: f32[32,32], index: 3, kind: input, shape index: {}]   ;;  %s1659_s4 = inlined_call_operand.vmem [shape: f32[1,32], index: 4, kind: input, shape index: {}]   ;;  %s1660_s5 = inlined_call_operand.vmem [shape: f32[1,32], index: 5, kind: input, shape index: {}]   ;;  %s1661_s6 = inlined_call_operand.vmem [shape: f32[1,32], index: 6, kind: input, shape index: {}]   ;;  %s1662_s7 = inlined_call_operand.vmem [shape: f32[32,128], index: 7, kind: input, shape index: {}]   ;;  %s1663_s8 = inlined_call_operand.vmem [shape: f32[1,128], index: 8, kind: input, shape index: {}]   ;;  %s1664_s9 = inlined_call_operand.vmem [shape: f32[128,32], index: 9, kind: input, shape index: {}]   ;;  %s1665_s10 = inlined_call_operand.vmem [shape: f32[1,32], index: 10, kind: input, shape index: {}]   ;;  %s1666_s11 = inlined_call_operand.vmem [shape: f32[1,32], index: 11, kind: input, shape index: {}]   ;;  %s1667_s12 = inlined_call_operand.vmem [shape: f32[1,32], index: 12, kind: input, shape index: {}]   ;;  %s1668_s13 = inlined_call_operand.vmem [shape: f32[256,64], index: 13, kind: input, shape index: {}]   ;;  %s1669_s14 = inlined_call_operand.vmem [shape: f32[1,64], index: 14, kind: input, shape index: {}]   ;;  %s1670_s15 = inlined_call_operand.hbm [shape: f32[2,64], index: 15, kind: output, shape index: {}]  }
   0x1   :  { %v56_v0 = vld [vmem:[%s1656_s1 + $0x18] sm:$0xff]  ;;  %v55_v1 = vld [vmem:[%s1656_s1 + $0x10] sm:$0xff]  ;;  %v54_v2 = vld [vmem:[%s1656_s1 + $0x8] sm:$0xff] }
   0x2   :  { %80 = vmatpush.msra.mxu0 %v56_v0  ;;  %v53_v3 = vld [vmem:[%s1656_s1] sm:$0xff] }
   0x3   :  { %v1300_v4 = vld [vmem:[%s1655_s0] sm:$0xff] }
   0x4   :  { %81 = vmatpush.msra.mxu0 %v55_v1 }
   0x6   :  { %82 = vmatpush.msra.mxu0 %v54_v2 }
   0x7   :  { %20 = vsyncpa [#allocation3], 0  ;;  %v1307_v5 = vld [vmem:[%s1655_s0 + $0x8] sm:$0xff]  ;;  %v1111_v6 = vld [vmem:[%s1657_s2] ss:$0 sm:$0xff]  ;;  %s1188_s16 = smov 80  }
   0x8   :  { %83 = vmatpush.msra.mxu0 %v53_v3  ;;  %s1189_s17 = smov 88   ;;  %s1190_s18 = smov 112   ;;  %vm94_vm1 = vcmask 64512   ;;  %vm364_vm2 = vcmask 130048   ;;  %vm366_vm3 = vcmask 195584  }
   0x9   :  { %1049 = vmatmul.msk.f32.vlgmr.msra.gmra.mxu0 %vm61_vm0, %v1300_v4  ;;  %s1191_s0 = smov 120   ;;  %s1192_s2 = smov 96  }
   0xa   :  { %s1193_s19 = smov 56   ;;  %s1194_s20 = smov 72  }
   0xb   :  { %s1195_s21 = smov 48   ;;  %s1196_s22 = smov 104  }
   0xc   :  { %s1197_s23 = smov 40   ;;  %s1198_s24 = smov 64  }
   0xd   :  { %s1199_s25 = smov 8   ;;  %s1200_s26 = smov 16  }
   0xe   :  { %s1201_s27 = smov 24  }
  0x11   :  { %1050 = vmatmul.msk.f32.gmra.mxu0 %vm61_vm0, %v1307_v5 }
  0x86   :  { %v85_v7 = vpop.f32.mrf.mxu0 }
  0x87   :  { %v1314_v8 = vadd.f32 %v1111_v6, %v85_v7 }
  0x89   :  { %223 = vrot.lane.b32.xlu1 %v1314_v8, %s1188_s16  ;;  %158 = vrot.lane.b32.xlu0 %v1314_v8, %s1189_s17 }
  0x8e   :  { %v88_v9 = vpop.f32.mrf.mxu0 }
  0x8f   :  { %v1323_v10 = vadd.f32 %v1111_v6, %v88_v9 }
  0x91   :  { %221 = vrot.lane.b32.xlu1 %v1314_v8, %s1190_s18  ;;  %156 = vrot.lane.b32.xlu0 %v1314_v8, %s1191_s0  ;;  %v1096_v2 = vpack.i.bf16 %v1323_v10, %v1314_v8 }
  0x99   :  { %92 = vrot.lane.b32.xlu0 %v1314_v8, %s1192_s2  ;;  %369 = vrot.lane.b32.xlu1 %v1323_v10, %s1192_s2 }
  0xa1   :  { %499 = vrot.lane.b32.xlu0 %v1323_v10, %s1188_s16 }
  0xfb   :  { %v224_v11 = vpop.permute.xlu1 %223  ;;  %v159_v12 = vpop.permute.xlu0 %158 }
  0xfc   :  { %1054 = vmatpush.xpose.msk.msra.mxu3 %vm94_vm1, %v159_v12  ;;  %1057 = vmatpush.xpose.msk.msra.mxu1 %vm94_vm1, %v224_v11 }
 0x103   :  { %v222_v13 = vpop.permute.xlu1 %221  ;;  %v157_v14 = vpop.permute.xlu0 %156 }
 0x104   :  { %1055 = vmatmul.msk.f32.vlgmr.msra.gmra.mxu3 %vm94_vm1, %v157_v14  ;;  %1058 = vmatmul.msk.f32.vlgmr.msra.gmra.mxu1 %vm94_vm1, %v222_v13 }
 0x10b   :  { %v93_v15 = vpop.permute.xlu0 %92  ;;  %v370_v35 = vpop.permute.xlu1 %369 }
 0x10c   :  { %1051 = vmatpush.xpose.msk.msrb.mxu0 %vm94_vm1, %v93_v15 }
 0x10f   :  { %1052 = vmatmul.msk.f32.vlgmr.msrb.gmra.mxu0 %vm94_vm1, %v1314_v8 }
 0x113   :  { %v500_v37 = vpop.permute.xlu0 %499 }
 0x181   :  { %v246_v16 = vpop.f32.mrf.mxu1 }
 0x182   :  { %v249_v17 = vsel %vm94_vm1, %v246_v16, -inf }
 0x183   :  { %250 = vmax.xlane.f32.xlu2 %v249_v17 }
 0x187   :  { %v181_v18 = vpop.f32.mrf.mxu3 }
 0x188   :  { %v184_v19 = vsel %vm94_vm1, %v181_v18, -inf }
 0x18b   :  { %185 = vmax.xlane.f32.xlu2 %v184_v19 }
 0x18c   :  { %v116_v22 = vpop.f32.mrf.mxu0 }
 0x18d   :  { %v119_v24 = vsel %vm94_vm1, %v116_v22, -inf }
 0x1a3   :  { %195 = vrot.lane.b32.xlu2 %v1314_v8, %s1193_s19 }
 0x1ab   :  { %288 = vrot.lane.b32.xlu2 %v1314_v8, %s1194_s20 }
 0x1b3   :  { %260 = vrot.lane.b32.xlu2 %v1314_v8, %s1195_s21 }
 0x1bb   :  { %286 = vrot.lane.b32.xlu2 %v1314_v8, %s1196_s22 }
 0x1c3   :  { %434 = vrot.lane.b32.xlu2 %v1323_v10, %s1189_s17 }
 0x1cb   :  { %432 = vrot.lane.b32.xlu2 %v1323_v10, %s1191_s0  ;;  %s1040_s0 = sshll.u32 %s1670_s15, 4  ;;  %s1041_s0 = int_to_ptr.hbm [resolvable:$true] %s1040_s0 }
 0x1d3   :  { %564 = vrot.lane.b32.xlu2 %v1323_v10, %s1194_s20 }
 0x1f6   :  { %v251_v20 = vpop.xlane.xlu2 %250 }
 0x1f7   :  { %v252_v21 = vsub.f32 %v246_v16, %v251_v20 }
 0x1f9   :  { %v253_v23 = vmul.f32 1.442695, %v252_v21 }
 0x1fb   :  { %1120 = vpow2.f32 %v253_v23 }
 0x1fc   :  { %120 = vmax.xlane.f32.xlu2 %v119_v24 }
 0x1fe   :  { %v186_v25 = vpop.xlane.xlu2 %185 }
 0x1ff   :  { %v187_v26 = vsub.f32 %v181_v18, %v186_v25 }
 0x201   :  { %v1121_v27 = vpop.eup %1120  ;;  %v188_v28 = vmul.f32 1.442695, %v187_v26 }
 0x202   :  { %v255_v29 = vsel %vm94_vm1, %v1121_v27, 0.0 }
 0x203   :  { %1122 = vpow2.f32 %v188_v28  ;;  %256 = vadd.xlane.f32.xlu1 %v255_v29 }
 0x206   :  { %v196_v30 = vpop.permute.xlu2 %195 }
 0x207   :  { %216 = vmatpush.msra.mxu2 %v196_v30 }
 0x209   :  { %v1123_v31 = vpop.eup %1122 }
 0x20a   :  { %v190_v32 = vsel %vm94_vm1, %v1123_v31, 0.0 }
 0x20b   :  { %191 = vadd.xlane.f32.xlu0 %v190_v32 }
 0x20e   :  { %v289_v33 = vpop.permute.xlu2 %288 }
 0x20f   :  { %1060 = vmatpush.xpose.msk.msrb.mxu2 %vm94_vm1, %v289_v33 }
 0x216   :  { %v261_v34 = vpop.permute.xlu2 %260 }
 0x217   :  { %281 = vmatpush.msrb.mxu3 %v261_v34 }
 0x219   :  { %1063 = vmatpush.xpose.msk.msra.mxu3 %vm94_vm1, %v370_v35 }
 0x21c   :  { %497 = vrot.lane.b32.xlu1 %v1323_v10, %s1190_s18 }
 0x21e   :  { %v287_v36 = vpop.permute.xlu2 %286 }
 0x21f   :  { %562 = vrot.lane.b32.xlu0 %v1323_v10, %s1196_s22 }
 0x226   :  { %v435_v39 = vpop.permute.xlu2 %434 }
 0x22e   :  { %v433_v44 = vpop.permute.xlu2 %432 }
 0x236   :  { %v565_v47 = vpop.permute.xlu2 %564 }
 0x26f   :  { %v121_v53 = vpop.xlane.xlu2 %120 }
 0x270   :  { %v122_v54 = vsub.f32 %v116_v22, %v121_v53 }
 0x272   :  { %v123_v57 = vmul.f32 1.442695, %v122_v54 }
 0x276   :  { %v257_v38 = vpop.xlane.xlu1 %256 }
 0x277   :  { %1124 = vrcp.f32 %v257_v38 }
 0x27d   :  { %v1125_v40 = vpop.eup %1124 }
 0x27e   :  { %v192_v41 = vpop.xlane.xlu0 %191  ;;  %v259_v42 = vmul.f32 %v1125_v40, %v1121_v27 }
 0x27f   :  { %1126 = vrcp.f32 %v192_v41 }
 0x280   :  { %1059 = vmatmul.msk.f32.vlgmr.msrb.gmra.mxu3 %vm94_vm1, %v259_v42  ;;  %1128 = vpow2.f32 %v123_v57 }
 0x281   :  { %1069 = vmatpush.xpose.msk.msrb.mxu3 %vm94_vm1, %v500_v37 }
 0x285   :  { %v1127_v43 = vpop.eup %1126 }
 0x286   :  { %v194_v45 = vmul.f32 %v1127_v43, %v1123_v31  ;;  %v1129_v62 = vpop.eup %1128 }
 0x287   :  { %v125_v0 = vsel %vm94_vm1, %v1129_v62, 0.0 }
 0x288   :  { %1056 = vmatmul.msk.f32.vlgmr.msra.gmra.mxu2 %vm94_vm1, %v194_v45  ;;  %1064 = vmatmul.msk.f32.vlgmr.msra.gmra.mxu3 %vm94_vm1, %v1323_v10 }
 0x289   :  { %1066 = vmatpush.xpose.msk.msra.mxu2 %vm94_vm1, %v435_v39 }
 0x28e   :  { %v498_v46 = vpop.permute.xlu1 %497 }
 0x290   :  { %1061 = vmatmul.msk.f32.vlgmr.msrb.gmra.mxu2 %vm94_vm1, %v287_v36  ;;  %1070 = vmatmul.msk.f32.vlgmr.msrb.gmra.mxu3 %vm94_vm1, %v498_v46 }
 0x291   :  { %1072 = vmatpush.xpose.msk.msrb.mxu2 %vm94_vm1, %v565_v47  ;;  %v563_v48 = vpop.permute.xlu0 %562 }
 0x298   :  { %1067 = vmatmul.msk.f32.vlgmr.msra.gmra.mxu2 %vm94_vm1, %v433_v44 }
 0x2a0   :  { %1073 = vmatmul.msk.f32.vlgmr.msrb.gmra.mxu2 %vm94_vm1, %v563_v48 }
 0x303   :  { %v1371_v49 = vpop.f32.mrf.mxu3 }
 0x30b   :  { %v218_v50 = vpop.f32.mrf.mxu2  ;;  %v392_v51 = vpop.f32.mrf.mxu3 }
 0x30c   :  { %v395_v52 = vsel %vm94_vm1, %v392_v51, -inf }
 0x30d   :  { %396 = vmax.xlane.f32.xlu0 %v395_v52 }
 0x313   :  { %v311_v55 = vpop.f32.mrf.mxu2  ;;  %v522_v58 = vpop.f32.mrf.mxu3 }
 0x314   :  { %v314_v56 = vsel %vm94_vm1, %v311_v55, -inf  ;;  %v525_v61 = vsel %vm94_vm1, %v522_v58, -inf }
 0x315   :  { %315 = vmax.xlane.f32.xlu1 %v314_v56 }
 0x31b   :  { %v457_v59 = vpop.f32.mrf.mxu2 }
 0x31c   :  { %v460_v60 = vsel %vm94_vm1, %v457_v59, -inf }
 0x31d   :  { %461 = vmax.xlane.f32.xlu2 %v460_v60  ;;  %526 = vmax.xlane.f32.xlu1 %v525_v61  ;;  %v644_v60 = vld [vmem:[%s1658_s3 + $0x10] sm:$0xff]  ;;  %v643_v61 = vld [vmem:[%s1658_s3 + $0x8] sm:$0xff] }
 0x323   :  { %v587_v63 = vpop.f32.mrf.mxu2 }
 0x324   :  { %v590_v1 = vsel %vm94_vm1, %v587_v63, -inf }
 0x325   :  { %126 = vadd.xlane.f32.xlu2 %v125_v0  ;;  %591 = vmax.xlane.f32.xlu0 %v590_v1  ;;  %v642_v0 = vld [vmem:[%s1658_s3] sm:$0xff] }
 0x339   :  { %325 = vrot.lane.b32.xlu0 %v1314_v8, %s1197_s23 }
 0x33d   :  { %1097 = vrot.lane.b32.xlu2 %v1096_v2, %s1198_s24 }
 0x345   :  { %471 = vrot.lane.b32.xlu2 %v1323_v10, %s1193_s19 }
 0x34d   :  { %352 = vrot.lane.b32.xlu2 %v218_v50, %s1199_s25 }
 0x380   :  { %v397_v3 = vpop.xlane.xlu0 %396 }
 0x381   :  { %v398_v6 = vsub.f32 %v392_v51, %v397_v3 }
 0x383   :  { %v399_v7 = vmul.f32 1.442695, %v398_v6 }
 0x385   :  { %1130 = vpow2.f32 %v399_v7 }
 0x388   :  { %v316_v9 = vpop.xlane.xlu1 %315 }
 0x389   :  { %v317_v11 = vsub.f32 %v311_v55, %v316_v9 }
 0x38b   :  { %v1131_v12 = vpop.eup %1130  ;;  %v318_v13 = vmul.f32 1.442695, %v317_v11 }
 0x38c   :  { %v401_v14 = vsel %vm94_vm1, %v1131_v12, 0.0 }
 0x38d   :  { %1132 = vpow2.f32 %v318_v13  ;;  %402 = vadd.xlane.f32.xlu0 %v401_v14 }
 0x390   :  { %v462_v8 = vpop.xlane.xlu2 %461  ;;  %v527_v15 = vpop.xlane.xlu1 %526 }
 0x391   :  { %v528_v16 = vsub.f32 %v522_v58, %v527_v15  ;;  %v463_v19 = vsub.f32 %v457_v59, %v462_v8  ;;  %v645_v59 = vld [vmem:[%s1658_s3 + $0x18] sm:$0xff] }
 0x392   :  { %668 = vmatpush.msra.mxu3 %v645_v59  ;;  %v797_v59 = vld [vmem:[%s1664_s9 + $0x70] sm:$0xff] }
 0x393   :  { %v1133_v17 = vpop.eup %1132  ;;  %v529_v18 = vmul.f32 1.442695, %v528_v16  ;;  %v464_v21 = vmul.f32 1.442695, %v463_v19  ;;  %v1112_v16 = vld [vmem:[%s1659_s4] ss:$0 sm:$0xff] }
 0x394   :  { %v320_v20 = vsel %vm94_vm1, %v1133_v17, 0.0  ;;  %669 = vmatpush.msra.mxu3 %v644_v60  ;;  %v796_v60 = vld [vmem:[%s1664_s9 + $0x68] sm:$0xff] }
 0x395   :  { %321 = vadd.xlane.f32.xlu1 %v320_v20  ;;  %1134 = vpow2.f32 %v529_v18 }
 0x396   :  { %670 = vmatpush.msra.mxu3 %v643_v61 }
 0x398   :  { %v127_v22 = vpop.xlane.xlu2 %126  ;;  %v592_v23 = vpop.xlane.xlu0 %591  ;;  %671 = vmatpush.msra.mxu3 %v642_v0 }
 0x399   :  { %1136 = vrcp.f32 %v127_v22  ;;  %v593_v25 = vsub.f32 %v587_v63, %v592_v23 }
 0x39a   :  { %1138 = vpow2.f32 %v464_v21 }
 0x39b   :  { %v1135_v24 = vpop.eup %1134  ;;  %v594_v28 = vmul.f32 1.442695, %v593_v25  ;;  %v1202_v25 = vmov 32.0  }
 0x39c   :  { %v531_v26 = vsel %vm94_vm1, %v1135_v24, 0.0 }
 0x39d   :  { %532 = vadd.xlane.f32.xlu1 %v531_v26  ;;  %1140 = vpow2.f32 %v594_v28 }
 0x39f   :  { %v1137_v27 = vpop.eup %1136 }
 0x3a0   :  { %v1098_v29 = vpop.permute.xlu2 %1097  ;;  %v1139_v32 = vpop.eup %1138  ;;  %v129_v33 = vmul.f32 %v1137_v27, %v1129_v62 }
 0x3a1   :  { %v1100_v30 = vunpack.i.h.bf16 %v1098_v29  ;;  %v1099_v31 = vunpack.i.l.bf16 %v1098_v29  ;;  %536 = vrot.lane.b32.xlu0 %v1323_v10, %s1195_s21  ;;  %v466_v34 = vsel %vm94_vm1, %v1139_v32, 0.0 }
 0x3a3   :  { %151 = vmatpush.msra.mxu0 %v1099_v31  ;;  %v1141_v35 = vpop.eup %1140 }
 0x3a4   :  { %1053 = vmatmul.msk.f32.vlgmr.msra.gmra.mxu0 %vm94_vm1, %v129_v33  ;;  %v596_v38 = vsel %vm94_vm1, %v1141_v35, 0.0 }
 0x3a5   :  { %427 = vmatpush.msrb.mxu0 %v1100_v30  ;;  %467 = vadd.xlane.f32.xlu1 %v466_v34 }
 0x3a8   :  { %v472_v37 = vpop.permute.xlu2 %471 }
 0x3a9   :  { %356 = vrot.lane.b32.xlu0 %v1371_v49, %s1200_s26 }
 0x3ab   :  { %v326_v36 = vpop.permute.xlu0 %325 }
 0x3ac   :  { %346 = vmatpush.msrb.mxu1 %v326_v36 }
 0x3ad   :  { %597 = vadd.xlane.f32.xlu1 %v596_v38 }
 0x3ae   :  { %492 = vmatpush.msra.mxu1 %v472_v37 }
 0x3b0   :  { %v353_v1 = vpop.permute.xlu2 %352 }
 0x3c6   :  { %601 = vrot.lane.b32.xlu1 %v1323_v10, %s1197_s23 }
 0x400   :  { %v403_v39 = vpop.xlane.xlu0 %402 }
 0x401   :  { %1142 = vrcp.f32 %v403_v39 }
 0x407   :  { %v1143_v40 = vpop.eup %1142 }
 0x408   :  { %v405_v41 = vmul.f32 %v1143_v40, %v1131_v12  ;;  %v322_v42 = vpop.xlane.xlu1 %321  ;;  %v747_v40 = vld [vmem:[%s1662_s7 + $0x18] sm:$0xff] }
 0x409   :  { %1144 = vrcp.f32 %v322_v42  ;;  %v745_v42 = vld [vmem:[%s1662_s7 + $0x8] sm:$0xff] }
 0x40a   :  { %1065 = vmatmul.msk.f32.vlgmr.msrb.gmra.mxu0 %vm94_vm1, %v405_v41  ;;  %v746_v41 = vld [vmem:[%s1662_s7 + $0x10] sm:$0xff] }
 0x40f   :  { %v1145_v43 = vpop.eup %1144 }
 0x410   :  { %v324_v44 = vmul.f32 %v1145_v43, %v1133_v17  ;;  %v533_v45 = vpop.xlane.xlu1 %532  ;;  %v744_v43 = vld [vmem:[%s1662_s7] sm:$0xff] }
 0x411   :  { %1146 = vrcp.f32 %v533_v45 }
 0x412   :  { %1062 = vmatmul.msk.f32.vlgmr.msrb.gmra.mxu1 %vm94_vm1, %v324_v44 }
 0x413   :  { %v537_v46 = vpop.permute.xlu0 %536 }
 0x414   :  { %557 = vmatpush.msra.mxu0 %v537_v46 }
 0x416   :  { %770 = vmatpush.msrb.mxu0 %v747_v40 }
 0x417   :  { %v1147_v47 = vpop.eup %1146 }
 0x418   :  { %v535_v48 = vmul.f32 %v1147_v47, %v1135_v24  ;;  %v468_v49 = vpop.xlane.xlu1 %467  ;;  %771 = vmatpush.msrb.mxu0 %v746_v41 }
 0x419   :  { %1148 = vrcp.f32 %v468_v49 }
 0x41a   :  { %1071 = vmatmul.msk.f32.vlgmr.msra.gmra.mxu0 %vm94_vm1, %v535_v48 }
 0x41b   :  { %v357_v3 = vpop.permute.xlu0 %356  ;;  %772 = vmatpush.msrb.mxu0 %v745_v42 }
 0x41d   :  { %773 = vmatpush.msrb.mxu0 %v744_v43 }
 0x41f   :  { %v1149_v10 = vpop.eup %1148 }
 0x420   :  { %v470_v50 = vmul.f32 %v1149_v10, %v1139_v32  ;;  %v598_v51 = vpop.xlane.xlu1 %597 }
 0x421   :  { %1150 = vrcp.f32 %v598_v51  ;;  %v153_v55 = vpop.f32.mrf.mxu0 }
 0x422   :  { %1068 = vmatmul.msk.f32.vlgmr.msra.gmra.mxu1 %vm94_vm1, %v470_v50  ;;  %v363_v2 = vsel %vm94_vm1, %v153_v55, %v353_v1  ;;  %1152 = vrcp.f32 %v1202_v25  ;;  %v1114_v55 = vld [vmem:[%s1661_s6] ss:$0 sm:$0xff]  ;;  %v794_v1 = vld [vmem:[%s1664_s9 + $0x58] sm:$0xff] }
 0x423   :  { %v365_v7 = vsel %vm364_vm2, %v363_v2, %v357_v3  ;;  %v793_v2 = vld [vmem:[%s1664_s9 + $0x50] sm:$0xff]  ;;  %v792_v3 = vld [vmem:[%s1664_s9 + $0x48] sm:$0xff]  ;;  %v783_v25 = vld [vmem:[%s1664_s9] sm:$0xff] }
 0x427   :  { %v1151_v52 = vpop.eup %1150 }
 0x428   :  { %v600_v53 = vmul.f32 %v1151_v52, %v1141_v35  ;;  %v1153_v26 = vpop.eup %1152  ;;  %v1113_v52 = vld [vmem:[%s1660_s5] ss:$0 sm:$0xff] }
 0x429   :  { %v688_v27 = vmul.f32 32.0, %v1153_v26  ;;  %vm692_vm4 = vweird.f32 %v1153_v26 }
 0x42b   :  { %v689_v28 = vsub.f32 1.0, %v688_v27 }
 0x42d   :  { %v690_v29 = vmul.f32 %v1153_v26, %v689_v28 }
 0x42f   :  { %v691_v30 = vadd.f32 %v1153_v26, %v690_v29 }
 0x431   :  { %v1429_v31 = vsel %vm692_vm4, %v1153_v26, %v691_v30  ;;  %v1115_v26 = vld [vmem:[%s1663_s8] ss:$0 sm:$0xff]  ;;  %vm950_vm4 = vcmask 785408  }
 0x438   :  { %v602_v54 = vpop.permute.xlu1 %601 }
 0x439   :  { %622 = vmatpush.msrb.mxu1 %v602_v54 }
 0x43a   :  { %1074 = vmatmul.msk.f32.vlgmr.msrb.gmra.mxu1 %vm94_vm1, %v600_v53 }
 0x487   :  { %v429_v57 = vpop.f32.mrf.mxu0 }
 0x48f   :  { %v348_v56 = vpop.f32.mrf.mxu1 }
 0x490   :  { %360 = vrot.lane.b32.xlu2 %v348_v56, %s1201_s27 }
 0x497   :  { %v559_v58 = vpop.f32.mrf.mxu0 }
 0x498   :  { %632 = vrot.lane.b32.xlu2 %v559_v58, %s1200_s26  ;;  %v798_v58 = vld [vmem:[%s1664_s9 + $0x78] sm:$0xff] }
 0x499   :  { %803 = vmatpush.msra.mxu2 %v798_v58 }
 0x49b   :  { %804 = vmatpush.msra.mxu2 %v797_v59 }
 0x49d   :  { %805 = vmatpush.msra.mxu2 %v796_v60 }
 0x49f   :  { %v494_v62 = vpop.f32.mrf.mxu1 }
 0x4a0   :  { %628 = vrot.lane.b32.xlu0 %v494_v62, %s1199_s25 }
 0x4b7   :  { %v624_v63 = vpop.f32.mrf.mxu1 }
 0x4b8   :  { %636 = vrot.lane.b32.xlu0 %v624_v63, %s1201_s27  ;;  %v795_v63 = vld [vmem:[%s1664_s9 + $0x60] sm:$0xff] }
 0x4b9   :  { %806 = vmatpush.msra.mxu2 %v795_v63 }
 0x4bb   :  { %807 = vmatpush.msra.mxu2 %v794_v1 }
 0x4bd   :  { %808 = vmatpush.msra.mxu2 %v793_v2  ;;  %v1117_v2 = vld [vmem:[%s1666_s11] ss:$0 sm:$0xff]  ;;  %s1203_s11 = smov 32  }
 0x4bf   :  { %809 = vmatpush.msra.mxu2 %v792_v3 }
 0x4ea   :  { %v361_v6 = vpop.permute.xlu2 %360 }
 0x4eb   :  { %v367_v9 = vsel %vm366_vm3, %v365_v7, %v361_v6  ;;  %v791_v6 = vld [vmem:[%s1664_s9 + $0x40] sm:$0xff] }
 0x4ec   :  { %1075 = vmatmul.msk.f32.vlgmr.msra.gmra.mxu3 %vm61_vm0, %v367_v9  ;;  %v790_v9 = vld [vmem:[%s1664_s9 + $0x38] sm:$0xff]  ;;  %810 = vmatpush.msra.mxu2 %v791_v6 }
 0x4ee   :  { %811 = vmatpush.msra.mxu2 %v790_v9 }
 0x4f2   :  { %v633_v13 = vpop.permute.xlu2 %632 }
 0x512   :  { %v629_v11 = vpop.permute.xlu0 %628 }
 0x513   :  { %v639_v12 = vsel %vm94_vm1, %v429_v57, %v629_v11 }
 0x514   :  { %v640_v8 = vsel %vm364_vm2, %v639_v12, %v633_v13  ;;  %v789_v12 = vld [vmem:[%s1664_s9 + $0x30] sm:$0xff]  ;;  %vm887_vm2 = vcmask 1040384  }
 0x515   :  { %812 = vmatpush.msra.mxu2 %v789_v12 }
 0x52a   :  { %v637_v14 = vpop.permute.xlu0 %636 }
 0x52b   :  { %v641_v15 = vsel %vm366_vm3, %v640_v8, %v637_v14  ;;  %v788_v14 = vld [vmem:[%s1664_s9 + $0x28] sm:$0xff]  ;;  %vm948_vm3 = vcmask 523264  }
 0x52c   :  { %1076 = vmatmul.msk.f32.gmra.mxu3 %vm61_vm0, %v641_v15  ;;  %v787_v15 = vld [vmem:[%s1664_s9 + $0x20] sm:$0xff]  ;;  %813 = vmatpush.msra.mxu2 %v788_v14 }
 0x52e   :  { %814 = vmatpush.msra.mxu2 %v787_v15 }
 0x56f   :  { %v673_v17 = vpop.f32.mrf.mxu3 }
 0x570   :  { %v674_v18 = vadd.f32 %v1112_v16, %v673_v17  ;;  %v786_v17 = vld [vmem:[%s1664_s9 + $0x18] sm:$0xff] }
 0x571   :  { %815 = vmatpush.msra.mxu2 %v786_v17 }
 0x572   :  { %v679_v19 = vadd.f32 %v674_v18, %v1300_v4 }
 0x574   :  { %v681_v20 = vsel %vm61_vm0, %v679_v19, 0.0 }
 0x575   :  { %682 = vadd.xlane.f32.xlu1 %v681_v20 }
 0x5af   :  { %v676_v21 = vpop.f32.mrf.mxu3 }
 0x5b0   :  { %v677_v22 = vadd.f32 %v1112_v16, %v676_v21 }
 0x5b2   :  { %v680_v23 = vadd.f32 %v677_v22, %v1307_v5 }
 0x5b4   :  { %v684_v24 = vsel %vm61_vm0, %v680_v23, 0.0 }
 0x5b5   :  { %685 = vadd.xlane.f32.xlu2 %v684_v24  ;;  %v784_v24 = vld [vmem:[%s1664_s9 + $0x8] sm:$0xff] }
 0x5e8   :  { %v683_v4 = vpop.xlane.xlu1 %682 }
 0x5e9   :  { %v694_v32 = vmul.f32 %v1429_v31, %v683_v4 }
 0x5eb   :  { %v696_v33 = vsub.f32 %v679_v19, %v694_v32 }
 0x5ed   :  { %v698_v34 = vmul.f32 %v696_v33, %v696_v33 }
 0x5ef   :  { %v700_v5 = vsel %vm61_vm0, %v698_v34, 0.0 }
 0x5f0   :  { %701 = vadd.xlane.f32.xlu0 %v700_v5 }
 0x628   :  { %v686_v35 = vpop.xlane.xlu2 %685 }
 0x629   :  { %v695_v36 = vmul.f32 %v1429_v31, %v686_v35 }
 0x62b   :  { %v1434_v37 = vsub.f32 %v680_v23, %v695_v36  ;;  %v785_v23 = vld [vmem:[%s1664_s9 + $0x10] sm:$0xff] }
 0x62c   :  { %816 = vmatpush.msra.mxu2 %v785_v23 }
 0x62d   :  { %v699_v38 = vmul.f32 %v1434_v37, %v1434_v37 }
 0x62e   :  { %817 = vmatpush.msra.mxu2 %v784_v24 }
 0x62f   :  { %v703_v39 = vsel %vm61_vm0, %v699_v38, 0.0 }
 0x630   :  { %704 = vadd.xlane.f32.xlu1 %v703_v39  ;;  %818 = vmatpush.msra.mxu2 %v783_v25 }
 0x663   :  { %v702_v44 = vpop.xlane.xlu0 %701 }
 0x664   :  { %v706_v45 = vmul.f32 %v702_v44, %v1429_v31 }
 0x666   :  { %v708_v46 = vadd.f32 1e-05, %v706_v45 }
 0x668   :  { %1154 = vrsqrt.f32 %v708_v46  ;;  %vm716_vm6 = vweird.f32 %v708_v46 }
 0x66e   :  { %v1155_v47 = vpop.eup %1154 }
 0x66f   :  { %v711_v48 = vmul.f32 %v1155_v47, %v708_v46  ;;  %vm717_vm5 = vweird.f32 %v1155_v47 }
 0x670   :  { %vm718_vm7 = vmor %vm716_vm6, %vm717_vm5  ;;  %vm1031_vm5 = vcmask 517120  }
 0x671   :  { %v712_v49 = vmul.f32 %v1155_v47, %v711_v48 }
 0x673   :  { %v713_v10 = vmul.f32 0.5, %v712_v49 }
 0x675   :  { %v714_v50 = vsub.f32 1.5, %v713_v10 }
 0x677   :  { %v715_v51 = vmul.f32 %v1155_v47, %v714_v50 }
 0x679   :  { %v719_v53 = vsel %vm718_vm7, %v1155_v47, %v715_v51 }
 0x67a   :  { %v730_v54 = vmul.f32 %v719_v53, %v696_v33  ;;  %v1116_v33 = vld [vmem:[%s1665_s10] ss:$0 sm:$0xff] }
 0x67c   :  { %v736_v56 = vmul.f32 %v1113_v52, %v730_v54 }
 0x67e   :  { %v1458_v57 = vadd.f32 %v1114_v55, %v736_v56 }
 0x680   :  { %1077 = vmatmul.msk.f32.vlgmr.msrb.gmra.mxu0 %vm61_vm0, %v1458_v57 }
 0x6a3   :  { %v705_v61 = vpop.xlane.xlu1 %704 }
 0x6a4   :  { %v707_v62 = vmul.f32 %v705_v61, %v1429_v31 }
 0x6a6   :  { %v709_v0 = vadd.f32 1e-05, %v707_v62 }
 0x6a8   :  { %1156 = vrsqrt.f32 %v709_v0  ;;  %vm726_vm9 = vweird.f32 %v709_v0 }
 0x6ae   :  { %v1157_v7 = vpop.eup %1156 }
 0x6af   :  { %v721_v11 = vmul.f32 %v1157_v7, %v709_v0  ;;  %vm727_vm8 = vweird.f32 %v1157_v7 }
 0x6b0   :  { %vm728_vm10 = vmor %vm726_vm9, %vm727_vm8 }
 0x6b1   :  { %v722_v13 = vmul.f32 %v1157_v7, %v721_v11 }
 0x6b3   :  { %v723_v8 = vmul.f32 0.5, %v722_v13 }
 0x6b5   :  { %v724_v16 = vsub.f32 1.5, %v723_v8 }
 0x6b7   :  { %v725_v18 = vmul.f32 %v1157_v7, %v724_v16 }
 0x6b9   :  { %v729_v19 = vsel %vm728_vm10, %v1157_v7, %v725_v18 }
 0x6ba   :  { %v731_v20 = vmul.f32 %v729_v19, %v1434_v37 }
 0x6bc   :  { %v737_v21 = vmul.f32 %v1113_v52, %v731_v20 }
 0x6be   :  { %v743_v22 = vadd.f32 %v1114_v55, %v737_v21 }
 0x6c0   :  { %1078 = vmatmul.msk.f32.gmra.mxu0 %vm61_vm0, %v743_v22 }
 0x6fd   :  { %v775_v27 = vpop.f32.mrf.mxu0 }
 0x6fe   :  { %v776_v28 = vadd.f32 %v1115_v26, %v775_v27 }
 0x700   :  { %v781_v29 = vmax.f32 %v776_v28, 0.0 }
 0x702   :  { %819 = vmatmul.f32.vlgmr.msra.gmra.mxu2 %v781_v29 }
 0x73d   :  { %v778_v30 = vpop.f32.mrf.mxu0 }
 0x73e   :  { %v779_v4 = vadd.f32 %v1115_v26, %v778_v30 }
 0x740   :  { %v782_v32 = vmax.f32 %v779_v4, 0.0 }
 0x742   :  { %822 = vmatmul.f32.gmra.mxu2 %v782_v32 }
 0x785   :  { %v820_v34 = vpop.f32.mrf.mxu2 }
 0x786   :  { %v821_v5 = vadd.f32 %v1116_v33, %v820_v34 }
 0x788   :  { %v826_v35 = vadd.f32 %v821_v5, %v1458_v57 }
 0x78a   :  { %v828_v36 = vsel %vm61_vm0, %v826_v35, 0.0 }
 0x78b   :  { %829 = vadd.xlane.f32.xlu2 %v828_v36 }
 0x7c5   :  { %v823_v37 = vpop.f32.mrf.mxu2 }
 0x7c6   :  { %v824_v38 = vadd.f32 %v1116_v33, %v823_v37 }
 0x7c8   :  { %v827_v39 = vadd.f32 %v824_v38, %v743_v22 }
 0x7ca   :  { %v831_v40 = vsel %vm61_vm0, %v827_v39, 0.0 }
 0x7cb   :  { %832 = vadd.xlane.f32.xlu0 %v831_v40  ;;  %v985_v40 = vld [vmem:[%s1668_s13 + $0xf0] sm:$0xff] }
 0x7fe   :  { %v830_v41 = vpop.xlane.xlu2 %829 }
 0x7ff   :  { %v834_v42 = vmul.f32 %v830_v41, %v1429_v31  ;;  %v970_v41 = vld [vmem:[%s1668_s13 + $0x78] sm:$0xff] }
 0x800   :  { %991 = vmatpush.msra.mxu1 %v970_v41 }
 0x801   :  { %v836_v43 = vsub.f32 %v826_v35, %v834_v42  ;;  %v969_v42 = vld [vmem:[%s1668_s13 + $0x70] sm:$0xff] }
 0x802   :  { %992 = vmatpush.msra.mxu1 %v969_v42 }
 0x803   :  { %v838_v44 = vmul.f32 %v836_v43, %v836_v43 }
 0x805   :  { %v840_v45 = vsel %vm61_vm0, %v838_v44, 0.0  ;;  %v968_v44 = vld [vmem:[%s1668_s13 + $0x68] sm:$0xff] }
 0x806   :  { %841 = vadd.xlane.f32.xlu1 %v840_v45  ;;  %v983_v45 = vld [vmem:[%s1668_s13 + $0xe0] sm:$0xff]  ;;  %993 = vmatpush.msra.mxu1 %v968_v44 }
 0x83e   :  { %v833_v46 = vpop.xlane.xlu0 %832 }
 0x83f   :  { %v835_v47 = vmul.f32 %v833_v46, %v1429_v31  ;;  %v967_v46 = vld [vmem:[%s1668_s13 + $0x60] sm:$0xff] }
 0x840   :  { %994 = vmatpush.msra.mxu1 %v967_v46 }
 0x841   :  { %v837_v48 = vsub.f32 %v827_v39, %v835_v47  ;;  %v986_v39 = vld [vmem:[%s1668_s13 + $0xf8] sm:$0xff] }
 0x842   :  { %1011 = vmatpush.msrb.mxu3 %v986_v39  ;;  %v982_v47 = vld [vmem:[%s1668_s13 + $0xd8] sm:$0xff] }
 0x843   :  { %v839_v49 = vmul.f32 %v837_v48, %v837_v48 }
 0x844   :  { %1012 = vmatpush.msrb.mxu3 %v985_v40 }
 0x845   :  { %v843_v10 = vsel %vm61_vm0, %v839_v49, 0.0  ;;  %v981_v49 = vld [vmem:[%s1668_s13 + $0xd0] sm:$0xff] }
 0x846   :  { %844 = vadd.xlane.f32.xlu2 %v843_v10  ;;  %v965_v10 = vld [vmem:[%s1668_s13 + $0x50] sm:$0xff] }
 0x879   :  { %v842_v50 = vpop.xlane.xlu1 %841 }
 0x87a   :  { %v846_v51 = vmul.f32 %v842_v50, %v1429_v31  ;;  %v980_v50 = vld [vmem:[%s1668_s13 + $0xc8] sm:$0xff] }
 0x87c   :  { %v848_v52 = vadd.f32 1e-05, %v846_v51  ;;  %v964_v51 = vld [vmem:[%s1668_s13 + $0x48] sm:$0xff] }
 0x87e   :  { %1158 = vrsqrt.f32 %v848_v52  ;;  %vm856_vm12 = vweird.f32 %v848_v52 }
 0x884   :  { %v1159_v53 = vpop.eup %1158 }
 0x885   :  { %v851_v54 = vmul.f32 %v1159_v53, %v848_v52  ;;  %vm857_vm11 = vweird.f32 %v1159_v53  ;;  %v979_v52 = vld [vmem:[%s1668_s13 + $0xc0] sm:$0xff] }
 0x886   :  { %vm858_vm13 = vmor %vm856_vm12, %vm857_vm11 }
 0x887   :  { %v852_v55 = vmul.f32 %v1159_v53, %v851_v54  ;;  %v978_v54 = vld [vmem:[%s1668_s13 + $0xb8] sm:$0xff] }
 0x889   :  { %v853_v56 = vmul.f32 0.5, %v852_v55  ;;  %v962_v55 = vld [vmem:[%s1668_s13 + $0x38] sm:$0xff] }
 0x88b   :  { %v854_v60 = vsub.f32 1.5, %v853_v56  ;;  %v977_v56 = vld [vmem:[%s1668_s13 + $0xb0] sm:$0xff] }
 0x88d   :  { %v855_v61 = vmul.f32 %v1159_v53, %v854_v60  ;;  %v975_v60 = vld [vmem:[%s1668_s13 + $0xa0] sm:$0xff] }
 0x88f   :  { %v859_v63 = vsel %vm858_vm13, %v1159_v53, %v855_v61  ;;  %v963_v53 = vld [vmem:[%s1668_s13 + $0x40] sm:$0xff]  ;;  %v974_v61 = vld [vmem:[%s1668_s13 + $0x98] sm:$0xff] }
 0x890   :  { %v870_v3 = vmul.f32 %v859_v63, %v836_v43  ;;  %v984_v43 = vld [vmem:[%s1668_s13 + $0xe8] sm:$0xff]  ;;  %v973_v63 = vld [vmem:[%s1668_s13 + $0x90] sm:$0xff] }
 0x891   :  { %1013 = vmatpush.msrb.mxu3 %v984_v43 }
 0x892   :  { %v876_v9 = vmul.f32 %v1117_v2, %v870_v3  ;;  %v971_v3 = vld [vmem:[%s1668_s13 + $0x80] sm:$0xff] }
 0x893   :  { %1014 = vmatpush.msrb.mxu3 %v983_v45 }
 0x895   :  { %1015 = vmatpush.msrb.mxu3 %v982_v47 }
 0x897   :  { %1016 = vmatpush.msrb.mxu3 %v981_v49 }
 0x899   :  { %1017 = vmatpush.msrb.mxu3 %v980_v50 }
 0x89b   :  { %1018 = vmatpush.msrb.mxu3 %v979_v52 }
 0x89d   :  { %1019 = vmatpush.msrb.mxu3 %v978_v54 }
 0x89f   :  { %1020 = vmatpush.msrb.mxu3 %v977_v56 }
 0x8b9   :  { %v845_v57 = vpop.xlane.xlu2 %844 }
 0x8ba   :  { %v847_v58 = vmul.f32 %v845_v57, %v1429_v31  ;;  %v1118_v31 = vld [vmem:[%s1667_s12] ss:$0 sm:$0xff]  ;;  %v961_v57 = vld [vmem:[%s1668_s13 + $0x30] sm:$0xff] }
 0x8bb   :  { %v882_v13 = vadd.f32 %v1118_v31, %v876_v9 }
 0x8bc   :  { %v849_v59 = vadd.f32 1e-05, %v847_v58  ;;  %v976_v58 = vld [vmem:[%s1668_s13 + $0xa8] sm:$0xff] }
 0x8bd   :  { %v918_v16 = vrot.slane %v882_v13, 7  ;;  %v893_v17 = vrot.slane %v882_v13, 2  ;;  %v913_v18 = vrot.slane %v882_v13, 6  ;;  %v890_v19 = vrot.slane %v882_v13, 1  ;;  %1021 = vmatpush.msrb.mxu3 %v976_v58 }
 0x8be   :  { %1160 = vrsqrt.f32 %v849_v59  ;;  %vm866_vm15 = vweird.f32 %v849_v59  ;;  %v908_v20 = vrot.slane %v882_v13, 5  ;;  %v903_v25 = vrot.slane %v882_v13, 4 }
 0x8bf   :  { %v898_v37 = vrot.slane %v882_v13, 3  ;;  %1022 = vmatpush.msrb.mxu3 %v975_v60 }
 0x8c1   :  { %1023 = vmatpush.msrb.mxu3 %v974_v61 }
 0x8c3   :  { %1024 = vmatpush.msrb.mxu3 %v973_v63 }
 0x8c4   :  { %v1161_v62 = vpop.eup %1160 }
 0x8c5   :  { %v861_v0 = vmul.f32 %v1161_v62, %v849_v59  ;;  %vm867_vm14 = vweird.f32 %v1161_v62  ;;  %v960_v59 = vld [vmem:[%s1668_s13 + $0x28] sm:$0xff] }
 0x8c6   :  { %vm868_vm1 = vmor %vm866_vm15, %vm867_vm14 }
 0x8c7   :  { %v862_v1 = vmul.f32 %v1161_v62, %v861_v0  ;;  %v958_v0 = vld [vmem:[%s1668_s13 + $0x18] sm:$0xff] }
 0x8c9   :  { %v863_v6 = vmul.f32 0.5, %v862_v1  ;;  %v972_v1 = vld [vmem:[%s1668_s13 + $0x88] sm:$0xff] }
 0x8ca   :  { %1025 = vmatpush.msrb.mxu3 %v972_v1 }
 0x8cb   :  { %v864_v7 = vsub.f32 1.5, %v863_v6  ;;  %v956_v6 = vld [vmem:[%s1668_s13 + $0x8] sm:$0xff] }
 0x8cc   :  { %1026 = vmatpush.msrb.mxu3 %v971_v3 }
 0x8cd   :  { %v865_v11 = vmul.f32 %v1161_v62, %v864_v7  ;;  %v955_v7 = vld [vmem:[%s1668_s13] sm:$0xff] }
 0x8cf   :  { %v869_v12 = vsel %vm868_vm1, %v1161_v62, %v865_v11  ;;  %v959_v62 = vld [vmem:[%s1668_s13 + $0x20] sm:$0xff] }
 0x8d0   :  { %v871_v14 = vmul.f32 %v869_v12, %v837_v48  ;;  %v966_v48 = vld [vmem:[%s1668_s13 + $0x58] sm:$0xff] }
 0x8d1   :  { %995 = vmatpush.msra.mxu1 %v966_v48 }
 0x8d2   :  { %v877_v8 = vmul.f32 %v1117_v2, %v871_v14  ;;  %v957_v2 = vld [vmem:[%s1668_s13 + $0x10] sm:$0xff] }
 0x8d3   :  { %996 = vmatpush.msra.mxu1 %v965_v10 }
 0x8d4   :  { %v883_v15 = vadd.f32 %v1118_v31, %v877_v8 }
 0x8d5   :  { %997 = vmatpush.msra.mxu1 %v964_v51 }
 0x8d6   :  { %v920_v21 = vrot.slane %v883_v15, 6  ;;  %v895_v22 = vrot.slane %v883_v15, 1  ;;  %v915_v23 = vrot.slane %v883_v15, 5  ;;  %v910_v24 = vrot.slane %v883_v15, 4 }
 0x8d7   :  { %v905_v26 = vrot.slane %v883_v15, 3  ;;  %v885_v27 = vrot.slane %v883_v15, 7  ;;  %v892_v32 = vsel %vm887_vm2, %v890_v19, %v883_v15  ;;  %v900_v36 = vrot.slane %v883_v15, 2  ;;  %998 = vmatpush.msra.mxu1 %v963_v53 }
 0x8d8   :  { %v922_v28 = vsel %vm887_vm2, %v918_v16, %v920_v21  ;;  %v897_v29 = vsel %vm887_vm2, %v893_v17, %v895_v22  ;;  %v917_v30 = vsel %vm887_vm2, %v913_v18, %v915_v23  ;;  %v912_v33 = vsel %vm887_vm2, %v908_v20, %v910_v24  ;;  %v1119_v22 = vld [vmem:[%s1669_s14] ss:$0 sm:$0xff] }
 0x8d9   :  { %944 = vrot.lane.b32.xlu2 %v922_v28, %s1192_s2  ;;  %v1106_v4 = vpack.i.bf16 %v897_v29, %v917_v30  ;;  %v1541_v34 = vsel %vm887_vm2, %v903_v25, %v905_v26  ;;  %v1101_v5 = vpack.i.bf16 %v892_v32, %v912_v33  ;;  %v1544_v35 = vsel %vm887_vm2, %v882_v13, %v885_v27 }
 0x8da   :  { %v902_v38 = vsel %vm887_vm2, %v898_v37, %v900_v36  ;;  %999 = vmatpush.msra.mxu1 %v962_v55 }
 0x8db   :  { %1107 = vrot.lane.b32.xlu1 %v1106_v4, %s1198_s24  ;;  %1102 = vrot.lane.b32.xlu0 %v1101_v5, %s1203_s11 }
 0x8dc   :  { %1000 = vmatpush.msra.mxu1 %v961_v57 }
 0x8de   :  { %1001 = vmatpush.msra.mxu1 %v960_v59 }
 0x8e0   :  { %1002 = vmatpush.msra.mxu1 %v959_v62 }
 0x8e2   :  { %1003 = vmatpush.msra.mxu1 %v958_v0 }
 0x8e3   :  { %932 = vrot.lane.b32.xlu0 %v902_v38, %s1192_s2  ;;  %s1204_s2 = smov [#allocation2]  }
 0x8e4   :  { %1004 = vmatpush.msra.mxu1 %v957_v2  ;;  %s1038_s17 = sshll.u32 %s1204_s2, 4  ;;  %s1039_s17 = int_to_ptr.vmem [resolvable:$true] %s1038_s17 }
 0x8e6   :  { %1005 = vmatpush.msra.mxu1 %v956_v6 }
 0x8e8   :  { %1006 = vmatpush.msra.mxu1 %v955_v7 }
 0x933   :  { %v945_v8 = vpop.permute.xlu2 %944 }
 0x94d   :  { %v1108_v31 = vpop.permute.xlu1 %1107  ;;  %v1103_v11 = vpop.permute.xlu0 %1102 }
 0x94e   :  { %v1109_v9 = vunpack.i.l.bf16 %v1108_v31  ;;  %v1105_v12 = vunpack.i.h.bf16 %v1103_v11  ;;  %v1104_v13 = vunpack.i.l.bf16 %v1103_v11  ;;  %v1110_v15 = vunpack.i.h.bf16 %v1108_v31 }
 0x950   :  { %v952_v14 = vsel %vm61_vm0, %v1541_v34, %v1104_v13  ;;  %v947_v18 = vsel %vm61_vm0, %v1544_v35, %v1105_v12 }
 0x951   :  { %v953_v16 = vsel %vm948_vm3, %v952_v14, %v1109_v9  ;;  %v949_v20 = vsel %vm948_vm3, %v947_v18, %v1110_v15 }
 0x952   :  { %v954_v17 = vsel %vm950_vm4, %v953_v16, %v945_v8 }
 0x953   :  { %1027 = vmatmul.f32.vlgmr.msrb.gmra.mxu3 %v954_v17 }
 0x955   :  { %v933_v19 = vpop.permute.xlu0 %932 }
 0x956   :  { %v951_v21 = vsel %vm950_vm4, %v949_v20, %v933_v19 }
 0x957   :  { %1007 = vmatmul.f32.vlgmr.msra.gmra.mxu1 %v951_v21 }
 0x9d4   :  { %v1008_v23 = vpop.f32.mrf.mxu1 }
 0x9d5   :  { %v1009_v24 = vadd.f32 %v1119_v22, %v1008_v23 }
 0x9d6   :  { %v1028_v25 = vpop.f32.mrf.mxu3 }
 0x9d7   :  { %v1029_v26 = vadd.f32 %v1028_v25, %v1009_v24 }
 0x9d9   :  { %1032 = vst.msk [vmem:[#allocation2] sm:$0x3] %vm1031_vm5, %v1029_v26 }
 0x9da   :  { %1043 = dma.vmem_to_hbm [thread:$0]  %s1039_s17, 32, %s1041_s0, [#allocation3]  }
 0x9db   :  { %1186 = dma.done.wait [#allocation3], 32  }
 0x9dc   :  { %1187 = vsyncadd [#allocation3], 4294967264 }
 0x9dd   :  { %1048 = vsyncpa [#allocation3], 1 }

</bundles_post_ra>
